<compile_context>
chip_gen: v7x
topology: tpu7x:2x2x1
jax: 0.10.0
libtpu: 0.0.40
codegen_flags: <defaults>
</compile_context>

<pallas_src>
import functools
import math

import jax
import jax.numpy as jnp
from jax import lax
from jax.experimental import pallas as pl
from jax.experimental.pallas import tpu as pltpu


# ----------------------------------------------------------------------------
# VMEM budget: 75% of physical per-core VMEM (96 MiB on v5e/v6e, 48 MiB on
# v7x); conservative 48 MiB fallback if the query is unavailable.
# ----------------------------------------------------------------------------
def _vmem_limit_bytes():
    try:
        return int(pltpu.get_tpu_info().vmem_capacity_bytes) * 3 // 4
    except Exception:  # pragma: no cover - non-TPU / older jax
        return 48 * 1024 * 1024


_VMEM_LIMIT_BYTES = _vmem_limit_bytes()
_BIG_VMEM = _VMEM_LIMIT_BYTES > 80 * 1024 * 1024   # v5e / v6e class parts


# ----------------------------------------------------------------------------
# helpers
# ----------------------------------------------------------------------------
def _pick_tile(dim, target, align):
    """Largest `align`-multiple tile <= target that divides dim, else full dim.

    TODO(synk): pad + mask edge tiles instead of the full-dim fallback when no
    aligned divisor exists (only matters for awkward large dims).
    """
    if dim <= target:
        return dim
    t = (target // align) * align
    while t >= align:
        if dim % t == 0:
            return t
        t -= align
    return dim


def _gelu(x):
    # tanh approximation (EUP tanh path).  nn.GELU() default is exact erf;
    # difference < ~1e-3.  TODO(synk): exact erf GELU if bit parity needed.
    c = math.sqrt(2.0 / math.pi)
    return 0.5 * x * (1.0 + jnp.tanh(c * (x + 0.044715 * x * x * x)))


# ----------------------------------------------------------------------------
# Kernel 1: tiled matmul + bias (+ optional activation)
#   x: (M, K), w: (K, N) [pre-transposed], b: (N,)
# ----------------------------------------------------------------------------
def _matmul_kernel(x_ref, w_ref, b_ref, o_ref, acc_ref, *, activation):
    k = pl.program_id(2)

    @pl.when(k == 0)
    def _():
        acc_ref[...] = jnp.zeros_like(acc_ref)

    acc_ref[...] += jnp.dot(x_ref[...], w_ref[...],
                            preferred_element_type=jnp.float32)

    @pl.when(k == pl.num_programs(2) - 1)
    def _():
        y = acc_ref[...] + b_ref[...].astype(jnp.float32)
        if activation == "relu":
            y = jnp.maximum(y, 0.0)
        elif activation == "gelu":
            y = _gelu(y)
        o_ref[...] = y.astype(o_ref.dtype)


def fused_linear(x, w, b, activation=None, *, tm=None, tn=None, tk=None):
    M, K = x.shape
    N = w.shape[1]
    # Bigger tiles where 128 MiB VMEM allows (v5e/v6e); conservative on v7x.
    tm = _pick_tile(M, tm if tm else (512 if _BIG_VMEM else 256), 8)
    tn = _pick_tile(N, tn if tn else (1024 if _BIG_VMEM else 512), 128)
    tk = _pick_tile(K, tk if tk else 512, 128)
    grid = (M // tm, N // tn, K // tk)
    return pl.pallas_call(
        functools.partial(_matmul_kernel, activation=activation),
        out_shape=jax.ShapeDtypeStruct((M, N), x.dtype),
        grid=grid,
        in_specs=[
            pl.BlockSpec((tm, tk), lambda i, j, k: (i, k)),
            pl.BlockSpec((tk, tn), lambda i, j, k: (k, j)),
            pl.BlockSpec((1, tn), lambda i, j, k: (0, j)),
        ],
        out_specs=pl.BlockSpec((tm, tn), lambda i, j, k: (i, j)),
        scratch_shapes=[pltpu.VMEM((tm, tn), jnp.float32)],
        compiler_params=pltpu.CompilerParams(
            dimension_semantics=("parallel", "parallel", "arbitrary"),
            vmem_limit_bytes=_VMEM_LIMIT_BYTES),
    )(x, w, b.reshape(1, N))


# ----------------------------------------------------------------------------
# Kernel 2: tiled matmul + bias + residual add + LayerNorm (post-norm epilogue)
#   out = LayerNorm(residual + x @ w + b)       (N = d_model kept whole)
# ----------------------------------------------------------------------------
def _matmul_add_ln_kernel(x_ref, w_ref, b_ref, r_ref, g_ref, be_ref,
                          o_ref, acc_ref, *, eps):
    k = pl.program_id(1)

    @pl.when(k == 0)
    def _():
        acc_ref[...] = jnp.zeros_like(acc_ref)

    acc_ref[...] += jnp.dot(x_ref[...], w_ref[...],
                            preferred_element_type=jnp.float32)

    @pl.when(k == pl.num_programs(1) - 1)
    def _():
        y = (acc_ref[...] + b_ref[...].astype(jnp.float32)
             + r_ref[...].astype(jnp.float32))
        mean = jnp.mean(y, axis=-1, keepdims=True)
        c = y - mean
        var = jnp.mean(c * c, axis=-1, keepdims=True)
        yn = c * lax.rsqrt(var + eps)
        o_ref[...] = (yn * g_ref[...].astype(jnp.float32)
                      + be_ref[...].astype(jnp.float32)).astype(o_ref.dtype)


def linear_add_layernorm(x, w, b, residual, gamma, beta, *, eps=1e-5,
                         tm=None, tk=None):
    M, K = x.shape
    N = w.shape[1]
    # The (tk, N) weight block is double-buffered next to the (tm, N) acc /
    # residual / output; keep tk small on 64 MiB parts.
    tm = _pick_tile(M, tm if tm else (512 if _BIG_VMEM else 256), 8)
    tk = _pick_tile(K, tk if tk else (512 if _BIG_VMEM else 256), 128)
    grid = (M // tm, K // tk)
    return pl.pallas_call(
        functools.partial(_matmul_add_ln_kernel, eps=eps),
        out_shape=jax.ShapeDtypeStruct((M, N), x.dtype),
        grid=grid,
        in_specs=[
            pl.BlockSpec((tm, tk), lambda i, k: (i, k)),
            pl.BlockSpec((tk, N), lambda i, k: (k, 0)),
            pl.BlockSpec((1, N), lambda i, k: (0, 0)),
            pl.BlockSpec((tm, N), lambda i, k: (i, 0)),
            pl.BlockSpec((1, N), lambda i, k: (0, 0)),
            pl.BlockSpec((1, N), lambda i, k: (0, 0)),
        ],
        out_specs=pl.BlockSpec((tm, N), lambda i, k: (i, 0)),
        scratch_shapes=[pltpu.VMEM((tm, N), jnp.float32)],
        compiler_params=pltpu.CompilerParams(
            dimension_semantics=("parallel", "arbitrary"),
            vmem_limit_bytes=_VMEM_LIMIT_BYTES),
    )(x, w, b.reshape(1, N), residual, gamma.reshape(1, N), beta.reshape(1, N))


# ----------------------------------------------------------------------------
# Kernel 3: flash-style multi-head attention.
#   q, k, v head-major: (B, H, T, dh).  grid = (B, H, Tq_tiles, Tk_tiles),
#   online softmax with (tq,1)/(tq,1)/(tq,dh) f32 scratch.
# ----------------------------------------------------------------------------
def _flash_attn_kernel(q_ref, k_ref, v_ref, mask_ref, o_ref,
                       m_sc, l_sc, acc_sc, *, scale, use_mask):
    ki = pl.program_id(3)

    @pl.when(ki == 0)
    def _():
        m_sc[...] = jnp.full(m_sc.shape, -jnp.inf, jnp.float32)
        l_sc[...] = jnp.zeros(l_sc.shape, jnp.float32)
        acc_sc[...] = jnp.zeros(acc_sc.shape, jnp.float32)

    # Scale folded into the (tq, dh) q block (cheaper than scaling scores).
    q = (q_ref[0, 0].astype(jnp.float32) * scale).astype(q_ref.dtype)
    k = k_ref[0, 0]
    v = v_ref[0, 0]

    # q @ k^T without materializing k.T (contract last dims on the MXU).
    s = lax.dot_general(q, k, (((1,), (1,)), ((), ())),
                        preferred_element_type=jnp.float32)       # (tq, tkv)
    if use_mask:
        s = s + mask_ref[...]

    m_prev = m_sc[...]
    m_new = jnp.maximum(m_prev, jnp.max(s, axis=-1, keepdims=True))
    alpha = jnp.exp(m_prev - m_new)
    p = jnp.exp(s - m_new)
    l_sc[...] = alpha * l_sc[...] + jnp.sum(p, axis=-1, keepdims=True)
    acc_sc[...] = alpha * acc_sc[...] + jnp.dot(
        p.astype(v.dtype), v, preferred_element_type=jnp.float32)
    m_sc[...] = m_new

    @pl.when(ki == pl.num_programs(3) - 1)
    def _():
        o_ref[0, 0] = (acc_sc[...] / l_sc[...]).astype(o_ref.dtype)


def mha_attention(q, k, v, mask, *, scale, tq_target=256, tkv_target=512):
    """q: (B, H, Tq, dh), k/v: (B, H, Tk, dh), mask: additive (Tq, Tk) or None."""
    B, H, Tq, dh = q.shape
    Tk = k.shape[2]
    tq = _pick_tile(Tq, tq_target, 8)
    tkv = _pick_tile(Tk, tkv_target, 128)
    use_mask = mask is not None
    if use_mask:
        mask = mask.astype(jnp.float32)
        mask_spec = pl.BlockSpec((tq, tkv), lambda b, h, qi, ki: (qi, ki))
    else:
        mask = jnp.zeros((1, 1), jnp.float32)           # never read in-kernel
        mask_spec = pl.BlockSpec((1, 1), lambda b, h, qi, ki: (0, 0))

    grid = (B, H, Tq // tq, Tk // tkv)
    return pl.pallas_call(
        functools.partial(_flash_attn_kernel, scale=scale, use_mask=use_mask),
        out_shape=jax.ShapeDtypeStruct((B, H, Tq, dh), q.dtype),
        grid=grid,
        in_specs=[
            pl.BlockSpec((1, 1, tq, dh), lambda b, h, qi, ki: (b, h, qi, 0)),
            pl.BlockSpec((1, 1, tkv, dh), lambda b, h, qi, ki: (b, h, ki, 0)),
            pl.BlockSpec((1, 1, tkv, dh), lambda b, h, qi, ki: (b, h, ki, 0)),
            mask_spec,
        ],
        out_specs=pl.BlockSpec((1, 1, tq, dh), lambda b, h, qi, ki: (b, h, qi, 0)),
        scratch_shapes=[pltpu.VMEM((tq, 1), jnp.float32),
                        pltpu.VMEM((tq, 1), jnp.float32),
                        pltpu.VMEM((tq, dh), jnp.float32)],
        compiler_params=pltpu.CompilerParams(
            dimension_semantics=("parallel", "parallel", "parallel", "arbitrary"),
            vmem_limit_bytes=_VMEM_LIMIT_BYTES),
    )(q, k, v, mask)


# ----------------------------------------------------------------------------
# Decoder layer (post-norm, GELU, dropout = identity / eval mode)
# ----------------------------------------------------------------------------
def faster_transformer_decoder_layer(tgt, memory, p, tgt_mask=None,
                                     memory_mask=None, *, nhead, eps=1e-5):
    """tgt: (T, B, D), memory: (S, B, D); masks are additive float (Tq, Tk)."""
    T, B, D = tgt.shape
    S = memory.shape[0]
    assert D % nhead == 0
    dh = D // nhead
    scale = 1.0 / math.sqrt(dh)

    # Internal batch-first layout: one activation transpose in and out.
    x_flat = jnp.transpose(tgt, (1, 0, 2)).reshape(B * T, D)
    mem_flat = jnp.transpose(memory, (1, 0, 2)).reshape(B * S, D)

    def split_heads(x, b, t):
        # (b*t, D) -> head-major (b, nhead, t, dh): lane-dense dh last dim.
        return jnp.transpose(x.reshape(b, t, nhead, dh), (0, 2, 1, 3))

    def merge_heads(x, b, t):
        return jnp.transpose(x, (0, 2, 1, 3)).reshape(b * t, D)

    # ---- self-attention: fused QKV, flash attention, out_proj+add+LN ----
    qkv = fused_linear(x_flat, p["sa_w_qkv"], p["sa_b_qkv"])          # (B*T, 3D)
    q = split_heads(qkv[:, :D], B, T)
    k = split_heads(qkv[:, D:2 * D], B, T)
    v = split_heads(qkv[:, 2 * D:], B, T)
    attn = mha_attention(q, k, v, tgt_mask, scale=scale)              # (B,H,T,dh)
    x_flat = linear_add_layernorm(merge_heads(attn, B, T),
                                  p["sa_w_out"], p["sa_b_out"],
                                  x_flat, p["norm1_g"], p["norm1_b"], eps=eps)

    # ---- cross-attention ----
    q = split_heads(fused_linear(x_flat, p["ca_w_q"], p["ca_b_q"]), B, T)
    kv = fused_linear(mem_flat, p["ca_w_kv"], p["ca_b_kv"])           # (B*S, 2D)
    k = split_heads(kv[:, :D], B, S)
    v = split_heads(kv[:, D:], B, S)
    attn = mha_attention(q, k, v, memory_mask, scale=scale)
    x_flat = linear_add_layernorm(merge_heads(attn, B, T),
                                  p["ca_w_out"], p["ca_b_out"],
                                  x_flat, p["norm2_g"], p["norm2_b"], eps=eps)

    # ---- feed-forward: lin1+GELU fused, lin2+add+LN fused ----
    h = fused_linear(x_flat, p["ff_w1"], p["ff_b1"], activation="gelu")
    x_flat = linear_add_layernorm(h, p["ff_w2"], p["ff_b2"],
                                  x_flat, p["norm3_g"], p["norm3_b"], eps=eps)

    return jnp.transpose(x_flat.reshape(B, T, D), (1, 0, 2))


# ----------------------------------------------------------------------------
# Parameters: pre-transposed to (in_features, out_features) and pre-fused
# (QKV / KV), converted once at load time.  bf16 by default for MXU
# throughput + halved HBM traffic; kernels accumulate in f32 regardless.
# ----------------------------------------------------------------------------
def make_params(key, d_model, dim_ff, dtype=jnp.bfloat16):
    ks = jax.random.split(key, 7)

    def init(k, shape):
        return (0.05 * jax.random.normal(k, shape, jnp.float32)).astype(dtype)

    z = lambda n: jnp.zeros((n,), dtype)
    o = lambda n: jnp.ones((n,), dtype)
    return {
        # self-attention (fused QKV)
        "sa_w_qkv": init(ks[0], (d_model, 3 * d_model)), "sa_b_qkv": z(3 * d_model),
        "sa_w_out": init(ks[1], (d_model, d_model)),     "sa_b_out": z(d_model),
        # cross-attention (Q from tgt, fused KV from memory)
        "ca_w_q":  init(ks[2], (d_model, d_model)),      "ca_b_q":  z(d_model),
        "ca_w_kv": init(ks[3], (d_model, 2 * d_model)),  "ca_b_kv": z(2 * d_model),
        "ca_w_out": init(ks[4], (d_model, d_model)),     "ca_b_out": z(d_model),
        # feed-forward
        "ff_w1": init(ks[5], (d_model, dim_ff)),         "ff_b1": z(dim_ff),
        "ff_w2": init(ks[6], (dim_ff, d_model)),         "ff_b2": z(d_model),
        # layer norms
        "norm1_g": o(d_model), "norm1_b": z(d_model),
        "norm2_g": o(d_model), "norm2_b": z(d_model),
        "norm3_g": o(d_model), "norm3_b": z(d_model),
    }


# ----------------------------------------------------------------------------
if __name__ == "__main__":
    # Small shapes: tgt_seq=8, mem_seq=8, batch=2, d_model=32, nhead=4, ff=64.
    T, S, B, D, NHEAD, DFF = 8, 8, 2, 32, 4, 64
    DTYPE = jnp.bfloat16

    key = jax.random.PRNGKey(0)
    k_tgt, k_mem, k_par = jax.random.split(key, 3)
    tgt = jax.random.normal(k_tgt, (T, B, D), jnp.float32).astype(DTYPE)
    memory = jax.random.normal(k_mem, (S, B, D), jnp.float32).astype(DTYPE)
    params = make_params(k_par, D, DFF, dtype=DTYPE)

    # Causal additive target mask, no memory mask.
    causal = jnp.where(jnp.arange(T)[:, None] >= jnp.arange(T)[None, :],
                       0.0, -1e9).astype(jnp.float32)

    @functools.partial(jax.jit, static_argnames=("nhead",))
    def fwd(tgt, memory, params, tgt_mask, nhead):
        return faster_transformer_decoder_layer(
            tgt, memory, params, tgt_mask=tgt_mask, memory_mask=None, nhead=nhead)

    out = fwd(tgt, memory, params, causal, NHEAD)
    out = jax.block_until_ready(out)
    assert out.shape == (T, B, D)
    assert bool(jnp.all(jnp.isfinite(out.astype(jnp.float32))))
    print("KERNEL_OK")
</pallas_src>

<mosaic_0001>
module attributes {stable_mosaic.version = 11 : i64} {
  func.func @_matmul_kernel(%arg0: i32, %arg1: i32, %arg2: i32, %arg3: memref<16x32xbf16, #tpu.memory_space<vmem>>, %arg4: memref<32x96xbf16, #tpu.memory_space<vmem>>, %arg5: memref<1x96xbf16, #tpu.memory_space<vmem>>, %arg6: memref<16x96xbf16, #tpu.memory_space<vmem>>, %arg7: memref<16x96xf32, #tpu.memory_space<vmem>>) attributes {dimension_semantics = [#tpu.dimension_semantics<parallel>, #tpu.dimension_semantics<parallel>, #tpu.dimension_semantics<arbitrary>], iteration_bounds = array<i64: 1, 1, 1>, scalar_prefetch = 0 : i64, scratch_operands = 1 : i64, tpu.core_type = #tpu.core_type<tc>, window_params = [{transform_indices = @transform_0, window_bounds = array<i64: 16, 32>}, {transform_indices = @transform_1, window_bounds = array<i64: 32, 96>}, {transform_indices = @transform_2, window_bounds = array<i64: 1, 96>}, {transform_indices = @transform_3, window_bounds = array<i64: 16, 96>}]} {
    %c0_i32 = arith.constant 0 : i32
    %0 = arith.cmpi eq, %arg2, %c0_i32 : i32
    %1 = arith.extui %0 : i1 to i32
    %c0_i32_0 = arith.constant 0 : i32
    %2 = arith.cmpi ne, %1, %c0_i32_0 : i32
    scf.if %2 {
      %cst_10 = arith.constant 0.000000e+00 : f32
      %12 = vector.broadcast %cst_10 : f32 to vector<16x96xf32>
      %c0_11 = arith.constant 0 : index
      %c0_12 = arith.constant 0 : index
      %13 = vector.load %arg7[%c0_11, %c0_12] : memref<16x96xf32, #tpu.memory_space<vmem>>, vector<16x96xf32>
      tpu.vector_store %arg7[%c0_11, %c0_12], %12 {strides = array<i32>} : memref<16x96xf32, #tpu.memory_space<vmem>>, vector<16x96xf32>,
    } else {
    }
    %c0 = arith.constant 0 : index
    %c0_1 = arith.constant 0 : index
    %3 = vector.load %arg7[%c0, %c0_1] : memref<16x96xf32, #tpu.memory_space<vmem>>, vector<16x96xf32>
    %c0_2 = arith.constant 0 : index
    %c0_3 = arith.constant 0 : index
    %4 = vector.load %arg3[%c0_2, %c0_3] : memref<16x32xbf16, #tpu.memory_space<vmem>>, vector<16x32xbf16>
    %c0_4 = arith.constant 0 : index
    %c0_5 = arith.constant 0 : index
    %5 = vector.load %arg4[%c0_4, %c0_5] : memref<32x96xbf16, #tpu.memory_space<vmem>>, vector<32x96xbf16>
    %cst = arith.constant dense<0.000000e+00> : vector<16x96xf32>
    %6 = tpu.matmul %4, %5, %cst {dimension_numbers = #tpu.dot_dimension_numbers<[1], [0], [0], [1], [0, 0, 1, 1], [], []>} : vector<16x32xbf16>, vector<32x96xbf16>, vector<16x96xf32> -> vector<16x96xf32>
    %7 = arith.addf %3, %6 : vector<16x96xf32>
    %c0_6 = arith.constant 0 : index
    %c0_7 = arith.constant 0 : index
    %8 = vector.load %arg7[%c0_6, %c0_7] : memref<16x96xf32, #tpu.memory_space<vmem>>, vector<16x96xf32>
    tpu.vector_store %arg7[%c0_6, %c0_7], %7 {strides = array<i32>} : memref<16x96xf32, #tpu.memory_space<vmem>>, vector<16x96xf32>,
    %c0_i32_8 = arith.constant 0 : i32
    %9 = arith.cmpi eq, %arg2, %c0_i32_8 : i32
    %10 = arith.extui %9 : i1 to i32
    %c0_i32_9 = arith.constant 0 : i32
    %11 = arith.cmpi ne, %10, %c0_i32_9 : i32
    scf.if %11 {
      %c0_10 = arith.constant 0 : index
      %c0_11 = arith.constant 0 : index
      %12 = vector.load %arg7[%c0_10, %c0_11] : memref<16x96xf32, #tpu.memory_space<vmem>>, vector<16x96xf32>
      %c0_12 = arith.constant 0 : index
      %c0_13 = arith.constant 0 : index
      %13 = vector.load %arg5[%c0_12, %c0_13] : memref<1x96xbf16, #tpu.memory_space<vmem>>, vector<1x96xbf16>
      %14 = arith.extf %13 : vector<1x96xbf16> to vector<1x96xf32>
      %15 = vector.broadcast %14 : vector<1x96xf32> to vector<16x96xf32>
      %16 = arith.addf %12, %15 : vector<16x96xf32>
      %17 = arith.truncf %16 : vector<16x96xf32> to vector<16x96xbf16>
      %c0_14 = arith.constant 0 : index
      %c0_15 = arith.constant 0 : index
      %18 = vector.load %arg6[%c0_14, %c0_15] : memref<16x96xbf16, #tpu.memory_space<vmem>>, vector<16x96xbf16>
      tpu.vector_store %arg6[%c0_14, %c0_15], %17 {strides = array<i32>} : memref<16x96xbf16, #tpu.memory_space<vmem>>, vector<16x96xbf16>,
    } else {
    }
    return
  }
  func.func @transform_0(%arg0: i32, %arg1: i32, %arg2: i32) -> (i32, i32) {
    %c0_i32 = arith.constant 0 : i32
    return %arg0, %arg2 : i32, i32
  }
  func.func @transform_1(%arg0: i32, %arg1: i32, %arg2: i32) -> (i32, i32) {
    %c0_i32 = arith.constant 0 : i32
    return %arg2, %arg1 : i32, i32
  }
  func.func @transform_2(%arg0: i32, %arg1: i32, %arg2: i32) -> (i32, i32) {
    %c0_i32 = arith.constant 0 : i32
    %c0_i32_0 = arith.constant 0 : i32
    return %c0_i32, %arg1 : i32, i32
  }
  func.func @transform_3(%arg0: i32, %arg1: i32, %arg2: i32) -> (i32, i32) {
    %c0_i32 = arith.constant 0 : i32
    return %arg0, %arg1 : i32, i32
  }
}

module attributes {stable_mosaic.version = 11 : i64} {
  func.func @_flash_attn_kernel(%arg0: i32, %arg1: i32, %arg2: i32, %arg3: i32, %arg4: memref<1x1x8x8xbf16, #tpu.memory_space<vmem>>, %arg5: memref<1x1x8x8xbf16, #tpu.memory_space<vmem>>, %arg6: memref<1x1x8x8xbf16, #tpu.memory_space<vmem>>, %arg7: memref<8x8xf32, #tpu.memory_space<vmem>>, %arg8: memref<1x1x8x8xbf16, #tpu.memory_space<vmem>>, %arg9: memref<8x1xf32, #tpu.memory_space<vmem>>, %arg10: memref<8x1xf32, #tpu.memory_space<vmem>>, %arg11: memref<8x8xf32, #tpu.memory_space<vmem>>) attributes {dimension_semantics = [#tpu.dimension_semantics<parallel>, #tpu.dimension_semantics<parallel>, #tpu.dimension_semantics<parallel>, #tpu.dimension_semantics<arbitrary>], iteration_bounds = array<i64: 2, 4, 1, 1>, scalar_prefetch = 0 : i64, scratch_operands = 3 : i64, tpu.core_type = #tpu.core_type<tc>, window_params = [{transform_indices = @transform_0, window_bounds = array<i64: 1, 1, 8, 8>}, {transform_indices = @transform_1, window_bounds = array<i64: 1, 1, 8, 8>}, {transform_indices = @transform_2, window_bounds = array<i64: 1, 1, 8, 8>}, {transform_indices = @transform_3, window_bounds = array<i64: 8, 8>}, {transform_indices = @transform_4, window_bounds = array<i64: 1, 1, 8, 8>}]} {
    %c0_i32 = arith.constant 0 : i32
    %0 = arith.cmpi eq, %arg3, %c0_i32 : i32
    %1 = arith.extui %0 : i1 to i32
    %c0_i32_0 = arith.constant 0 : i32
    %2 = arith.cmpi ne, %1, %c0_i32_0 : i32
    scf.if %2 {
      %cst_32 = arith.constant 0xFF800000 : f32
      %42 = vector.broadcast %cst_32 : f32 to vector<8x1xf32>
      %c0_33 = arith.constant 0 : index
      %c0_34 = arith.constant 0 : index
      %43 = vector.load %arg9[%c0_33, %c0_34] : memref<8x1xf32, #tpu.memory_space<vmem>>, vector<8x1xf32>
      tpu.vector_store %arg9[%c0_33, %c0_34], %42 {strides = array<i32>} : memref<8x1xf32, #tpu.memory_space<vmem>>, vector<8x1xf32>,
      %cst_35 = arith.constant 0.000000e+00 : f32
      %44 = vector.broadcast %cst_35 : f32 to vector<8x1xf32>
      %c0_36 = arith.constant 0 : index
      %c0_37 = arith.constant 0 : index
      %45 = vector.load %arg10[%c0_36, %c0_37] : memref<8x1xf32, #tpu.memory_space<vmem>>, vector<8x1xf32>
      tpu.vector_store %arg10[%c0_36, %c0_37], %44 {strides = array<i32>} : memref<8x1xf32, #tpu.memory_space<vmem>>, vector<8x1xf32>,
      %cst_38 = arith.constant 0.000000e+00 : f32
      %46 = vector.broadcast %cst_38 : f32 to vector<8x8xf32>
      %c0_39 = arith.constant 0 : index
      %c0_40 = arith.constant 0 : index
      %47 = vector.load %arg11[%c0_39, %c0_40] : memref<8x8xf32, #tpu.memory_space<vmem>>, vector<8x8xf32>
      tpu.vector_store %arg11[%c0_39, %c0_40], %46 {strides = array<i32>} : memref<8x8xf32, #tpu.memory_space<vmem>>, vector<8x8xf32>,
    } else {
    }
    %c0 = arith.constant 0 : index
    %c0_1 = arith.constant 0 : index
    %c0_2 = arith.constant 0 : index
    %c0_3 = arith.constant 0 : index
    %3 = vector.load %arg4[%c0, %c0_1, %c0_2, %c0_3] : memref<1x1x8x8xbf16, #tpu.memory_space<vmem>>, vector<1x1x8x8xbf16>
    %4 = vector.shape_cast %3 : vector<1x1x8x8xbf16> to vector<8x8xbf16>
    %5 = arith.extf %4 : vector<8x8xbf16> to vector<8x8xf32>
    %cst = arith.constant 0.353553385 : f32
    %6 = vector.broadcast %cst : f32 to vector<8x8xf32>
    %7 = arith.mulf %5, %6 : vector<8x8xf32>
    %8 = arith.truncf %7 : vector<8x8xf32> to vector<8x8xbf16>
    %c0_4 = arith.constant 0 : index
    %c0_5 = arith.constant 0 : index
    %c0_6 = arith.constant 0 : index
    %c0_7 = arith.constant 0 : index
    %9 = vector.load %arg5[%c0_4, %c0_5, %c0_6, %c0_7] : memref<1x1x8x8xbf16, #tpu.memory_space<vmem>>, vector<1x1x8x8xbf16>
    %10 = vector.shape_cast %9 : vector<1x1x8x8xbf16> to vector<8x8xbf16>
    %c0_8 = arith.constant 0 : index
    %c0_9 = arith.constant 0 : index
    %c0_10 = arith.constant 0 : index
    %c0_11 = arith.constant 0 : index
    %11 = vector.load %arg6[%c0_8, %c0_9, %c0_10, %c0_11] : memref<1x1x8x8xbf16, #tpu.memory_space<vmem>>, vector<1x1x8x8xbf16>
    %12 = vector.shape_cast %11 : vector<1x1x8x8xbf16> to vector<8x8xbf16>
    %cst_12 = arith.constant dense<0.000000e+00> : vector<8x8xf32>
    %13 = tpu.matmul %8, %10, %cst_12 {dimension_numbers = #tpu.dot_dimension_numbers<[1], [1], [0], [0], [0, 0, 1, 0], [], []>} : vector<8x8xbf16>, vector<8x8xbf16>, vector<8x8xf32> -> vector<8x8xf32>
    %c0_13 = arith.constant 0 : index
    %c0_14 = arith.constant 0 : index
    %14 = vector.load %arg7[%c0_13, %c0_14] : memref<8x8xf32, #tpu.memory_space<vmem>>, vector<8x8xf32>
    %15 = arith.addf %13, %14 : vector<8x8xf32>
    %c0_15 = arith.constant 0 : index
    %c0_16 = arith.constant 0 : index
    %16 = vector.load %arg9[%c0_15, %c0_16] : memref<8x1xf32, #tpu.memory_space<vmem>>, vector<8x1xf32>
    %cst_17 = arith.constant dense<0xFF800000> : vector<8xf32>
    %17 = vector.multi_reduction <maximumf>, %15, %cst_17 [1] : vector<8x8xf32> to vector<8xf32>
    %18 = vector.shape_cast %17 : vector<8xf32> to vector<8x1xf32>
    %19 = arith.maximumf %16, %18 : vector<8x1xf32>
    %20 = arith.subf %16, %19 : vector<8x1xf32>
    %21 = math.exp %20 : vector<8x1xf32>
    %22 = vector.broadcast %19 : vector<8x1xf32> to vector<8x8xf32>
    %23 = arith.subf %15, %22 : vector<8x8xf32>
    %24 = math.exp %23 : vector<8x8xf32>
    %c0_18 = arith.constant 0 : index
    %c0_19 = arith.constant 0 : index
    %25 = vector.load %arg10[%c0_18, %c0_19] : memref<8x1xf32, #tpu.memory_space<vmem>>, vector<8x1xf32>
    %26 = arith.mulf %21, %25 : vector<8x1xf32>
    %cst_20 = arith.constant dense<0.000000e+00> : vector<8xf32>
    %27 = vector.multi_reduction <add>, %24, %cst_20 [1] : vector<8x8xf32> to vector<8xf32>
    %28 = vector.shape_cast %27 : vector<8xf32> to vector<8x1xf32>
    %29 = arith.addf %26, %28 : vector<8x1xf32>
    %c0_21 = arith.constant 0 : index
    %c0_22 = arith.constant 0 : index
    %30 = vector.load %arg10[%c0_21, %c0_22] : memref<8x1xf32, #tpu.memory_space<vmem>>, vector<8x1xf32>
    tpu.vector_store %arg10[%c0_21, %c0_22], %29 {strides = array<i32>} : memref<8x1xf32, #tpu.memory_space<vmem>>, vector<8x1xf32>,
    %c0_23 = arith.constant 0 : index
    %c0_24 = arith.constant 0 : index
    %31 = vector.load %arg11[%c0_23, %c0_24] : memref<8x8xf32, #tpu.memory_space<vmem>>, vector<8x8xf32>
    %32 = vector.broadcast %21 : vector<8x1xf32> to vector<8x8xf32>
    %33 = arith.mulf %32, %31 : vector<8x8xf32>
    %34 = arith.truncf %24 : vector<8x8xf32> to vector<8x8xbf16>
    %cst_25 = arith.constant dense<0.000000e+00> : vector<8x8xf32>
    %35 = tpu.matmul %34, %12, %cst_25 {dimension_numbers = #tpu.dot_dimension_numbers<[1], [0], [0], [1], [0, 0, 1, 1], [], []>} : vector<8x8xbf16>, vector<8x8xbf16>, vector<8x8xf32> -> vector<8x8xf32>
    %36 = arith.addf %33, %35 : vector<8x8xf32>
    %c0_26 = arith.constant 0 : index
    %c0_27 = arith.constant 0 : index
    %37 = vector.load %arg11[%c0_26, %c0_27] : memref<8x8xf32, #tpu.memory_space<vmem>>, vector<8x8xf32>
    tpu.vector_store %arg11[%c0_26, %c0_27], %36 {strides = array<i32>} : memref<8x8xf32, #tpu.memory_space<vmem>>, vector<8x8xf32>,
    %c0_28 = arith.constant 0 : index
    %c0_29 = arith.constant 0 : index
    %38 = vector.load %arg9[%c0_28, %c0_29] : memref<8x1xf32, #tpu.memory_space<vmem>>, vector<8x1xf32>
    tpu.vector_store %arg9[%c0_28, %c0_29], %19 {strides = array<i32>} : memref<8x1xf32, #tpu.memory_space<vmem>>, vector<8x1xf32>,
    %c0_i32_30 = arith.constant 0 : i32
    %39 = arith.cmpi eq, %arg3, %c0_i32_30 : i32
    %40 = arith.extui %39 : i1 to i32
    %c0_i32_31 = arith.constant 0 : i32
    %41 = arith.cmpi ne, %40, %c0_i32_31 : i32
    scf.if %41 {
      %c0_32 = arith.constant 0 : index
      %c0_33 = arith.constant 0 : index
      %42 = vector.load %arg11[%c0_32, %c0_33] : memref<8x8xf32, #tpu.memory_space<vmem>>, vector<8x8xf32>
      %c0_34 = arith.constant 0 : index
      %c0_35 = arith.constant 0 : index
      %43 = vector.load %arg10[%c0_34, %c0_35] : memref<8x1xf32, #tpu.memory_space<vmem>>, vector<8x1xf32>
      %44 = vector.broadcast %43 : vector<8x1xf32> to vector<8x8xf32>
      %45 = arith.divf %42, %44 : vector<8x8xf32>
      %46 = arith.truncf %45 : vector<8x8xf32> to vector<8x8xbf16>
      %c0_36 = arith.constant 0 : index
      %c0_37 = arith.constant 0 : index
      %c0_38 = arith.constant 0 : index
      %c0_39 = arith.constant 0 : index
      %47 = vector.load %arg8[%c0_36, %c0_37, %c0_38, %c0_39] : memref<1x1x8x8xbf16, #tpu.memory_space<vmem>>, vector<1x1x8x8xbf16>
      %48 = vector.shape_cast %47 : vector<1x1x8x8xbf16> to vector<8x8xbf16>
      %49 = vector.shape_cast %46 : vector<8x8xbf16> to vector<1x1x8x8xbf16>
      tpu.vector_store %arg8[%c0_36, %c0_37, %c0_38, %c0_39], %49 {strides = array<i32>} : memref<1x1x8x8xbf16, #tpu.memory_space<vmem>>, vector<1x1x8x8xbf16>,
    } else {
    }
    return
  }
  func.func @transform_0(%arg0: i32, %arg1: i32, %arg2: i32, %arg3: i32) -> (i32, i32, i32, i32) {
    %c0_i32 = arith.constant 0 : i32
    %c0_i32_0 = arith.constant 0 : i32
    return %arg0, %arg1, %arg2, %c0_i32 : i32, i32, i32, i32
  }
  func.func @transform_1(%arg0: i32, %arg1: i32, %arg2: i32, %arg3: i32) -> (i32, i32, i32, i32) {
    %c0_i32 = arith.constant 0 : i32
    %c0_i32_0 = arith.constant 0 : i32
    return %arg0, %arg1, %arg3, %c0_i32 : i32, i32, i32, i32
  }
  func.func @transform_2(%arg0: i32, %arg1: i32, %arg2: i32, %arg3: i32) -> (i32, i32, i32, i32) {
    %c0_i32 = arith.constant 0 : i32
    %c0_i32_0 = arith.constant 0 : i32
    return %arg0, %arg1, %arg3, %c0_i32 : i32, i32, i32, i32
  }
  func.func @transform_3(%arg0: i32, %arg1: i32, %arg2: i32, %arg3: i32) -> (i32, i32) {
    %c0_i32 = arith.constant 0 : i32
    return %arg2, %arg3 : i32, i32
  }
  func.func @transform_4(%arg0: i32, %arg1: i32, %arg2: i32, %arg3: i32) -> (i32, i32, i32, i32) {
    %c0_i32 = arith.constant 0 : i32
    %c0_i32_0 = arith.constant 0 : i32
    return %arg0, %arg1, %arg2, %c0_i32 : i32, i32, i32, i32
  }
}

module attributes {stable_mosaic.version = 11 : i64} {
  func.func @_matmul_add_ln_kernel(%arg0: i32, %arg1: i32, %arg2: memref<16x32xbf16, #tpu.memory_space<vmem>>, %arg3: memref<32x32xbf16, #tpu.memory_space<vmem>>, %arg4: memref<1x32xbf16, #tpu.memory_space<vmem>>, %arg5: memref<16x32xbf16, #tpu.memory_space<vmem>>, %arg6: memref<1x32xbf16, #tpu.memory_space<vmem>>, %arg7: memref<1x32xbf16, #tpu.memory_space<vmem>>, %arg8: memref<16x32xbf16, #tpu.memory_space<vmem>>, %arg9: memref<16x32xf32, #tpu.memory_space<vmem>>) attributes {dimension_semantics = [#tpu.dimension_semantics<parallel>, #tpu.dimension_semantics<arbitrary>], iteration_bounds = array<i64: 1, 1>, scalar_prefetch = 0 : i64, scratch_operands = 1 : i64, tpu.core_type = #tpu.core_type<tc>, window_params = [{transform_indices = @transform_0, window_bounds = array<i64: 16, 32>}, {transform_indices = @transform_1, window_bounds = array<i64: 32, 32>}, {pipeline_mode = #tpu.pipeline_mode<synchronous>, transform_indices = @transform_2, window_bounds = array<i64: 1, 32>}, {transform_indices = @transform_3, window_bounds = array<i64: 16, 32>}, {pipeline_mode = #tpu.pipeline_mode<synchronous>, transform_indices = @transform_4, window_bounds = array<i64: 1, 32>}, {pipeline_mode = #tpu.pipeline_mode<synchronous>, transform_indices = @transform_5, window_bounds = array<i64: 1, 32>}, {transform_indices = @transform_6, window_bounds = array<i64: 16, 32>}]} {
    %c0_i32 = arith.constant 0 : i32
    %0 = arith.cmpi eq, %arg1, %c0_i32 : i32
    %1 = arith.extui %0 : i1 to i32
    %c0_i32_0 = arith.constant 0 : i32
    %2 = arith.cmpi ne, %1, %c0_i32_0 : i32
    scf.if %2 {
      %cst_10 = arith.constant 0.000000e+00 : f32
      %12 = vector.broadcast %cst_10 : f32 to vector<16x32xf32>
      %c0_11 = arith.constant 0 : index
      %c0_12 = arith.constant 0 : index
      %13 = vector.load %arg9[%c0_11, %c0_12] : memref<16x32xf32, #tpu.memory_space<vmem>>, vector<16x32xf32>
      tpu.vector_store %arg9[%c0_11, %c0_12], %12 {strides = array<i32>} : memref<16x32xf32, #tpu.memory_space<vmem>>, vector<16x32xf32>,
    } else {
    }
    %c0 = arith.constant 0 : index
    %c0_1 = arith.constant 0 : index
    %3 = vector.load %arg9[%c0, %c0_1] : memref<16x32xf32, #tpu.memory_space<vmem>>, vector<16x32xf32>
    %c0_2 = arith.constant 0 : index
    %c0_3 = arith.constant 0 : index
    %4 = vector.load %arg2[%c0_2, %c0_3] : memref<16x32xbf16, #tpu.memory_space<vmem>>, vector<16x32xbf16>
    %c0_4 = arith.constant 0 : index
    %c0_5 = arith.constant 0 : index
    %5 = vector.load %arg3[%c0_4, %c0_5] : memref<32x32xbf16, #tpu.memory_space<vmem>>, vector<32x32xbf16>
    %cst = arith.constant dense<0.000000e+00> : vector<16x32xf32>
    %6 = tpu.matmul %4, %5, %cst {dimension_numbers = #tpu.dot_dimension_numbers<[1], [0], [0], [1], [0, 0, 1, 1], [], []>} : vector<16x32xbf16>, vector<32x32xbf16>, vector<16x32xf32> -> vector<16x32xf32>
    %7 = arith.addf %3, %6 : vector<16x32xf32>
    %c0_6 = arith.constant 0 : index
    %c0_7 = arith.constant 0 : index
    %8 = vector.load %arg9[%c0_6, %c0_7] : memref<16x32xf32, #tpu.memory_space<vmem>>, vector<16x32xf32>
    tpu.vector_store %arg9[%c0_6, %c0_7], %7 {strides = array<i32>} : memref<16x32xf32, #tpu.memory_space<vmem>>, vector<16x32xf32>,
    %c0_i32_8 = arith.constant 0 : i32
    %9 = arith.cmpi eq, %arg1, %c0_i32_8 : i32
    %10 = arith.extui %9 : i1 to i32
    %c0_i32_9 = arith.constant 0 : i32
    %11 = arith.cmpi ne, %10, %c0_i32_9 : i32
    scf.if %11 {
      %c0_10 = arith.constant 0 : index
      %c0_11 = arith.constant 0 : index
      %12 = vector.load %arg9[%c0_10, %c0_11] : memref<16x32xf32, #tpu.memory_space<vmem>>, vector<16x32xf32>
      %c0_12 = arith.constant 0 : index
      %c0_13 = arith.constant 0 : index
      %13 = vector.load %arg4[%c0_12, %c0_13] : memref<1x32xbf16, #tpu.memory_space<vmem>>, vector<1x32xbf16>
      %14 = arith.extf %13 : vector<1x32xbf16> to vector<1x32xf32>
      %15 = vector.broadcast %14 : vector<1x32xf32> to vector<16x32xf32>
      %16 = arith.addf %12, %15 : vector<16x32xf32>
      %c0_14 = arith.constant 0 : index
      %c0_15 = arith.constant 0 : index
      %17 = vector.load %arg5[%c0_14, %c0_15] : memref<16x32xbf16, #tpu.memory_space<vmem>>, vector<16x32xbf16>
      %18 = arith.extf %17 : vector<16x32xbf16> to vector<16x32xf32>
      %19 = arith.addf %16, %18 : vector<16x32xf32>
      %cst_16 = arith.constant dense<0.000000e+00> : vector<16xf32>
      %20 = vector.multi_reduction <add>, %19, %cst_16 [1] : vector<16x32xf32> to vector<16xf32>
      %21 = vector.shape_cast %20 : vector<16xf32> to vector<16x1xf32>
      %cst_17 = arith.constant 3.200000e+01 : f32
      %22 = vector.broadcast %cst_17 : f32 to vector<16x1xf32>
      %23 = arith.divf %21, %22 : vector<16x1xf32>
      %24 = vector.broadcast %23 : vector<16x1xf32> to vector<16x32xf32>
      %25 = arith.subf %19, %24 : vector<16x32xf32>
      %26 = arith.mulf %25, %25 : vector<16x32xf32>
      %cst_18 = arith.constant dense<0.000000e+00> : vector<16xf32>
      %27 = vector.multi_reduction <add>, %26, %cst_18 [1] : vector<16x32xf32> to vector<16xf32>
      %28 = vector.shape_cast %27 : vector<16xf32> to vector<16x1xf32>
      %cst_19 = arith.constant 3.200000e+01 : f32
      %29 = vector.broadcast %cst_19 : f32 to vector<16x1xf32>
      %30 = arith.divf %28, %29 : vector<16x1xf32>
      %cst_20 = arith.constant 9.99999974E-6 : f32
      %31 = vector.broadcast %cst_20 : f32 to vector<16x1xf32>
      %32 = arith.addf %30, %31 : vector<16x1xf32>
      %33 = math.rsqrt %32 : vector<16x1xf32>
      %34 = vector.broadcast %33 : vector<16x1xf32> to vector<16x32xf32>
      %35 = arith.mulf %25, %34 : vector<16x32xf32>
      %c0_21 = arith.constant 0 : index
      %c0_22 = arith.constant 0 : index
      %36 = vector.load %arg6[%c0_21, %c0_22] : memref<1x32xbf16, #tpu.memory_space<vmem>>, vector<1x32xbf16>
      %37 = arith.extf %36 : vector<1x32xbf16> to vector<1x32xf32>
      %38 = vector.broadcast %37 : vector<1x32xf32> to vector<16x32xf32>
      %39 = arith.mulf %35, %38 : vector<16x32xf32>
      %c0_23 = arith.constant 0 : index
      %c0_24 = arith.constant 0 : index
      %40 = vector.load %arg7[%c0_23, %c0_24] : memref<1x32xbf16, #tpu.memory_space<vmem>>, vector<1x32xbf16>
      %41 = arith.extf %40 : vector<1x32xbf16> to vector<1x32xf32>
      %42 = vector.broadcast %41 : vector<1x32xf32> to vector<16x32xf32>
      %43 = arith.addf %39, %42 : vector<16x32xf32>
      %44 = arith.truncf %43 : vector<16x32xf32> to vector<16x32xbf16>
      %c0_25 = arith.constant 0 : index
      %c0_26 = arith.constant 0 : index
      %45 = vector.load %arg8[%c0_25, %c0_26] : memref<16x32xbf16, #tpu.memory_space<vmem>>, vector<16x32xbf16>
      tpu.vector_store %arg8[%c0_25, %c0_26], %44 {strides = array<i32>} : memref<16x32xbf16, #tpu.memory_space<vmem>>, vector<16x32xbf16>,
    } else {
    }
    return
  }
  func.func @transform_0(%arg0: i32, %arg1: i32) -> (i32, i32) {
    %c0_i32 = arith.constant 0 : i32
    return %arg0, %arg1 : i32, i32
  }
  func.func @transform_1(%arg0: i32, %arg1: i32) -> (i32, i32) {
    %c0_i32 = arith.constant 0 : i32
    %c0_i32_0 = arith.constant 0 : i32
    return %arg1, %c0_i32 : i32, i32
  }
  func.func @transform_2(%arg0: i32, %arg1: i32) -> (i32, i32) {
    %c0_i32 = arith.constant 0 : i32
    %c0_i32_0 = arith.constant 0 : i32
    %c0_i32_1 = arith.constant 0 : i32
    return %c0_i32, %c0_i32_0 : i32, i32
  }
  func.func @transform_3(%arg0: i32, %arg1: i32) -> (i32, i32) {
    %c0_i32 = arith.constant 0 : i32
    %c0_i32_0 = arith.constant 0 : i32
    return %arg0, %c0_i32 : i32, i32
  }
  func.func @transform_4(%arg0: i32, %arg1: i32) -> (i32, i32) {
    %c0_i32 = arith.constant 0 : i32
    %c0_i32_0 = arith.constant 0 : i32
    %c0_i32_1 = arith.constant 0 : i32
    return %c0_i32, %c0_i32_0 : i32, i32
  }
  func.func @transform_5(%arg0: i32, %arg1: i32) -> (i32, i32) {
    %c0_i32 = arith.constant 0 : i32
    %c0_i32_0 = arith.constant 0 : i32
    %c0_i32_1 = arith.constant 0 : i32
    return %c0_i32, %c0_i32_0 : i32, i32
  }
  func.func @transform_6(%arg0: i32, %arg1: i32) -> (i32, i32) {
    %c0_i32 = arith.constant 0 : i32
    %c0_i32_0 = arith.constant 0 : i32
    return %arg0, %c0_i32 : i32, i32
  }
}

module attributes {stable_mosaic.version = 11 : i64} {
  func.func @_matmul_kernel(%arg0: i32, %arg1: i32, %arg2: i32, %arg3: memref<16x32xbf16, #tpu.memory_space<vmem>>, %arg4: memref<32x32xbf16, #tpu.memory_space<vmem>>, %arg5: memref<1x32xbf16, #tpu.memory_space<vmem>>, %arg6: memref<16x32xbf16, #tpu.memory_space<vmem>>, %arg7: memref<16x32xf32, #tpu.memory_space<vmem>>) attributes {dimension_semantics = [#tpu.dimension_semantics<parallel>, #tpu.dimension_semantics<parallel>, #tpu.dimension_semantics<arbitrary>], iteration_bounds = array<i64: 1, 1, 1>, scalar_prefetch = 0 : i64, scratch_operands = 1 : i64, tpu.core_type = #tpu.core_type<tc>, window_params = [{transform_indices = @transform_0, window_bounds = array<i64: 16, 32>}, {transform_indices = @transform_1, window_bounds = array<i64: 32, 32>}, {transform_indices = @transform_2, window_bounds = array<i64: 1, 32>}, {transform_indices = @transform_3, window_bounds = array<i64: 16, 32>}]} {
    %c0_i32 = arith.constant 0 : i32
    %0 = arith.cmpi eq, %arg2, %c0_i32 : i32
    %1 = arith.extui %0 : i1 to i32
    %c0_i32_0 = arith.constant 0 : i32
    %2 = arith.cmpi ne, %1, %c0_i32_0 : i32
    scf.if %2 {
      %cst_10 = arith.constant 0.000000e+00 : f32
      %12 = vector.broadcast %cst_10 : f32 to vector<16x32xf32>
      %c0_11 = arith.constant 0 : index
      %c0_12 = arith.constant 0 : index
      %13 = vector.load %arg7[%c0_11, %c0_12] : memref<16x32xf32, #tpu.memory_space<vmem>>, vector<16x32xf32>
      tpu.vector_store %arg7[%c0_11, %c0_12], %12 {strides = array<i32>} : memref<16x32xf32, #tpu.memory_space<vmem>>, vector<16x32xf32>,
    } else {
    }
    %c0 = arith.constant 0 : index
    %c0_1 = arith.constant 0 : index
    %3 = vector.load %arg7[%c0, %c0_1] : memref<16x32xf32, #tpu.memory_space<vmem>>, vector<16x32xf32>
    %c0_2 = arith.constant 0 : index
    %c0_3 = arith.constant 0 : index
    %4 = vector.load %arg3[%c0_2, %c0_3] : memref<16x32xbf16, #tpu.memory_space<vmem>>, vector<16x32xbf16>
    %c0_4 = arith.constant 0 : index
    %c0_5 = arith.constant 0 : index
    %5 = vector.load %arg4[%c0_4, %c0_5] : memref<32x32xbf16, #tpu.memory_space<vmem>>, vector<32x32xbf16>
    %cst = arith.constant dense<0.000000e+00> : vector<16x32xf32>
    %6 = tpu.matmul %4, %5, %cst {dimension_numbers = #tpu.dot_dimension_numbers<[1], [0], [0], [1], [0, 0, 1, 1], [], []>} : vector<16x32xbf16>, vector<32x32xbf16>, vector<16x32xf32> -> vector<16x32xf32>
    %7 = arith.addf %3, %6 : vector<16x32xf32>
    %c0_6 = arith.constant 0 : index
    %c0_7 = arith.constant 0 : index
    %8 = vector.load %arg7[%c0_6, %c0_7] : memref<16x32xf32, #tpu.memory_space<vmem>>, vector<16x32xf32>
    tpu.vector_store %arg7[%c0_6, %c0_7], %7 {strides = array<i32>} : memref<16x32xf32, #tpu.memory_space<vmem>>, vector<16x32xf32>,
    %c0_i32_8 = arith.constant 0 : i32
    %9 = arith.cmpi eq, %arg2, %c0_i32_8 : i32
    %10 = arith.extui %9 : i1 to i32
    %c0_i32_9 = arith.constant 0 : i32
    %11 = arith.cmpi ne, %10, %c0_i32_9 : i32
    scf.if %11 {
      %c0_10 = arith.constant 0 : index
      %c0_11 = arith.constant 0 : index
      %12 = vector.load %arg7[%c0_10, %c0_11] : memref<16x32xf32, #tpu.memory_space<vmem>>, vector<16x32xf32>
      %c0_12 = arith.constant 0 : index
      %c0_13 = arith.constant 0 : index
      %13 = vector.load %arg5[%c0_12, %c0_13] : memref<1x32xbf16, #tpu.memory_space<vmem>>, vector<1x32xbf16>
      %14 = arith.extf %13 : vector<1x32xbf16> to vector<1x32xf32>
      %15 = vector.broadcast %14 : vector<1x32xf32> to vector<16x32xf32>
      %16 = arith.addf %12, %15 : vector<16x32xf32>
      %17 = arith.truncf %16 : vector<16x32xf32> to vector<16x32xbf16>
      %c0_14 = arith.constant 0 : index
      %c0_15 = arith.constant 0 : index
      %18 = vector.load %arg6[%c0_14, %c0_15] : memref<16x32xbf16, #tpu.memory_space<vmem>>, vector<16x32xbf16>
      tpu.vector_store %arg6[%c0_14, %c0_15], %17 {strides = array<i32>} : memref<16x32xbf16, #tpu.memory_space<vmem>>, vector<16x32xbf16>,
    } else {
    }
    return
  }
  func.func @transform_0(%arg0: i32, %arg1: i32, %arg2: i32) -> (i32, i32) {
    %c0_i32 = arith.constant 0 : i32
    return %arg0, %arg2 : i32, i32
  }
  func.func @transform_1(%arg0: i32, %arg1: i32, %arg2: i32) -> (i32, i32) {
    %c0_i32 = arith.constant 0 : i32
    return %arg2, %arg1 : i32, i32
  }
  func.func @transform_2(%arg0: i32, %arg1: i32, %arg2: i32) -> (i32, i32) {
    %c0_i32 = arith.constant 0 : i32
    %c0_i32_0 = arith.constant 0 : i32
    return %c0_i32, %arg1 : i32, i32
  }
  func.func @transform_3(%arg0: i32, %arg1: i32, %arg2: i32) -> (i32, i32) {
    %c0_i32 = arith.constant 0 : i32
    return %arg0, %arg1 : i32, i32
  }
}

module attributes {stable_mosaic.version = 11 : i64} {
  func.func @_matmul_kernel(%arg0: i32, %arg1: i32, %arg2: i32, %arg3: memref<16x32xbf16, #tpu.memory_space<vmem>>, %arg4: memref<32x64xbf16, #tpu.memory_space<vmem>>, %arg5: memref<1x64xbf16, #tpu.memory_space<vmem>>, %arg6: memref<16x64xbf16, #tpu.memory_space<vmem>>, %arg7: memref<16x64xf32, #tpu.memory_space<vmem>>) attributes {dimension_semantics = [#tpu.dimension_semantics<parallel>, #tpu.dimension_semantics<parallel>, #tpu.dimension_semantics<arbitrary>], iteration_bounds = array<i64: 1, 1, 1>, scalar_prefetch = 0 : i64, scratch_operands = 1 : i64, tpu.core_type = #tpu.core_type<tc>, window_params = [{transform_indices = @transform_0, window_bounds = array<i64: 16, 32>}, {transform_indices = @transform_1, window_bounds = array<i64: 32, 64>}, {transform_indices = @transform_2, window_bounds = array<i64: 1, 64>}, {transform_indices = @transform_3, window_bounds = array<i64: 16, 64>}]} {
    %c0_i32 = arith.constant 0 : i32
    %0 = arith.cmpi eq, %arg2, %c0_i32 : i32
    %1 = arith.extui %0 : i1 to i32
    %c0_i32_0 = arith.constant 0 : i32
    %2 = arith.cmpi ne, %1, %c0_i32_0 : i32
    scf.if %2 {
      %cst_10 = arith.constant 0.000000e+00 : f32
      %12 = vector.broadcast %cst_10 : f32 to vector<16x64xf32>
      %c0_11 = arith.constant 0 : index
      %c0_12 = arith.constant 0 : index
      %13 = vector.load %arg7[%c0_11, %c0_12] : memref<16x64xf32, #tpu.memory_space<vmem>>, vector<16x64xf32>
      tpu.vector_store %arg7[%c0_11, %c0_12], %12 {strides = array<i32>} : memref<16x64xf32, #tpu.memory_space<vmem>>, vector<16x64xf32>,
    } else {
    }
    %c0 = arith.constant 0 : index
    %c0_1 = arith.constant 0 : index
    %3 = vector.load %arg7[%c0, %c0_1] : memref<16x64xf32, #tpu.memory_space<vmem>>, vector<16x64xf32>
    %c0_2 = arith.constant 0 : index
    %c0_3 = arith.constant 0 : index
    %4 = vector.load %arg3[%c0_2, %c0_3] : memref<16x32xbf16, #tpu.memory_space<vmem>>, vector<16x32xbf16>
    %c0_4 = arith.constant 0 : index
    %c0_5 = arith.constant 0 : index
    %5 = vector.load %arg4[%c0_4, %c0_5] : memref<32x64xbf16, #tpu.memory_space<vmem>>, vector<32x64xbf16>
    %cst = arith.constant dense<0.000000e+00> : vector<16x64xf32>
    %6 = tpu.matmul %4, %5, %cst {dimension_numbers = #tpu.dot_dimension_numbers<[1], [0], [0], [1], [0, 0, 1, 1], [], []>} : vector<16x32xbf16>, vector<32x64xbf16>, vector<16x64xf32> -> vector<16x64xf32>
    %7 = arith.addf %3, %6 : vector<16x64xf32>
    %c0_6 = arith.constant 0 : index
    %c0_7 = arith.constant 0 : index
    %8 = vector.load %arg7[%c0_6, %c0_7] : memref<16x64xf32, #tpu.memory_space<vmem>>, vector<16x64xf32>
    tpu.vector_store %arg7[%c0_6, %c0_7], %7 {strides = array<i32>} : memref<16x64xf32, #tpu.memory_space<vmem>>, vector<16x64xf32>,
    %c0_i32_8 = arith.constant 0 : i32
    %9 = arith.cmpi eq, %arg2, %c0_i32_8 : i32
    %10 = arith.extui %9 : i1 to i32
    %c0_i32_9 = arith.constant 0 : i32
    %11 = arith.cmpi ne, %10, %c0_i32_9 : i32
    scf.if %11 {
      %c0_10 = arith.constant 0 : index
      %c0_11 = arith.constant 0 : index
      %12 = vector.load %arg7[%c0_10, %c0_11] : memref<16x64xf32, #tpu.memory_space<vmem>>, vector<16x64xf32>
      %c0_12 = arith.constant 0 : index
      %c0_13 = arith.constant 0 : index
      %13 = vector.load %arg5[%c0_12, %c0_13] : memref<1x64xbf16, #tpu.memory_space<vmem>>, vector<1x64xbf16>
      %14 = arith.extf %13 : vector<1x64xbf16> to vector<1x64xf32>
      %15 = vector.broadcast %14 : vector<1x64xf32> to vector<16x64xf32>
      %16 = arith.addf %12, %15 : vector<16x64xf32>
      %17 = arith.truncf %16 : vector<16x64xf32> to vector<16x64xbf16>
      %c0_14 = arith.constant 0 : index
      %c0_15 = arith.constant 0 : index
      %18 = vector.load %arg6[%c0_14, %c0_15] : memref<16x64xbf16, #tpu.memory_space<vmem>>, vector<16x64xbf16>
      tpu.vector_store %arg6[%c0_14, %c0_15], %17 {strides = array<i32>} : memref<16x64xbf16, #tpu.memory_space<vmem>>, vector<16x64xbf16>,
    } else {
    }
    return
  }
  func.func @transform_0(%arg0: i32, %arg1: i32, %arg2: i32) -> (i32, i32) {
    %c0_i32 = arith.constant 0 : i32
    return %arg0, %arg2 : i32, i32
  }
  func.func @transform_1(%arg0: i32, %arg1: i32, %arg2: i32) -> (i32, i32) {
    %c0_i32 = arith.constant 0 : i32
    return %arg2, %arg1 : i32, i32
  }
  func.func @transform_2(%arg0: i32, %arg1: i32, %arg2: i32) -> (i32, i32) {
    %c0_i32 = arith.constant 0 : i32
    %c0_i32_0 = arith.constant 0 : i32
    return %c0_i32, %arg1 : i32, i32
  }
  func.func @transform_3(%arg0: i32, %arg1: i32, %arg2: i32) -> (i32, i32) {
    %c0_i32 = arith.constant 0 : i32
    return %arg0, %arg1 : i32, i32
  }
}

module attributes {stable_mosaic.version = 11 : i64} {
  func.func @_flash_attn_kernel(%arg0: i32, %arg1: i32, %arg2: i32, %arg3: i32, %arg4: memref<1x1x8x8xbf16, #tpu.memory_space<vmem>>, %arg5: memref<1x1x8x8xbf16, #tpu.memory_space<vmem>>, %arg6: memref<1x1x8x8xbf16, #tpu.memory_space<vmem>>, %arg7: memref<1x1xf32, #tpu.memory_space<vmem>>, %arg8: memref<1x1x8x8xbf16, #tpu.memory_space<vmem>>, %arg9: memref<8x1xf32, #tpu.memory_space<vmem>>, %arg10: memref<8x1xf32, #tpu.memory_space<vmem>>, %arg11: memref<8x8xf32, #tpu.memory_space<vmem>>) attributes {dimension_semantics = [#tpu.dimension_semantics<parallel>, #tpu.dimension_semantics<parallel>, #tpu.dimension_semantics<parallel>, #tpu.dimension_semantics<arbitrary>], iteration_bounds = array<i64: 2, 4, 1, 1>, scalar_prefetch = 0 : i64, scratch_operands = 3 : i64, tpu.core_type = #tpu.core_type<tc>, window_params = [{transform_indices = @transform_0, window_bounds = array<i64: 1, 1, 8, 8>}, {transform_indices = @transform_1, window_bounds = array<i64: 1, 1, 8, 8>}, {transform_indices = @transform_2, window_bounds = array<i64: 1, 1, 8, 8>}, {pipeline_mode = #tpu.pipeline_mode<synchronous>, transform_indices = @transform_3, window_bounds = array<i64: 1, 1>}, {transform_indices = @transform_4, window_bounds = array<i64: 1, 1, 8, 8>}]} {
    %c0_i32 = arith.constant 0 : i32
    %0 = arith.cmpi eq, %arg3, %c0_i32 : i32
    %1 = arith.extui %0 : i1 to i32
    %c0_i32_0 = arith.constant 0 : i32
    %2 = arith.cmpi ne, %1, %c0_i32_0 : i32
    scf.if %2 {
      %cst_30 = arith.constant 0xFF800000 : f32
      %40 = vector.broadcast %cst_30 : f32 to vector<8x1xf32>
      %c0_31 = arith.constant 0 : index
      %c0_32 = arith.constant 0 : index
      %41 = vector.load %arg9[%c0_31, %c0_32] : memref<8x1xf32, #tpu.memory_space<vmem>>, vector<8x1xf32>
      tpu.vector_store %arg9[%c0_31, %c0_32], %40 {strides = array<i32>} : memref<8x1xf32, #tpu.memory_space<vmem>>, vector<8x1xf32>,
      %cst_33 = arith.constant 0.000000e+00 : f32
      %42 = vector.broadcast %cst_33 : f32 to vector<8x1xf32>
      %c0_34 = arith.constant 0 : index
      %c0_35 = arith.constant 0 : index
      %43 = vector.load %arg10[%c0_34, %c0_35] : memref<8x1xf32, #tpu.memory_space<vmem>>, vector<8x1xf32>
      tpu.vector_store %arg10[%c0_34, %c0_35], %42 {strides = array<i32>} : memref<8x1xf32, #tpu.memory_space<vmem>>, vector<8x1xf32>,
      %cst_36 = arith.constant 0.000000e+00 : f32
      %44 = vector.broadcast %cst_36 : f32 to vector<8x8xf32>
      %c0_37 = arith.constant 0 : index
      %c0_38 = arith.constant 0 : index
      %45 = vector.load %arg11[%c0_37, %c0_38] : memref<8x8xf32, #tpu.memory_space<vmem>>, vector<8x8xf32>
      tpu.vector_store %arg11[%c0_37, %c0_38], %44 {strides = array<i32>} : memref<8x8xf32, #tpu.memory_space<vmem>>, vector<8x8xf32>,
    } else {
    }
    %c0 = arith.constant 0 : index
    %c0_1 = arith.constant 0 : index
    %c0_2 = arith.constant 0 : index
    %c0_3 = arith.constant 0 : index
    %3 = vector.load %arg4[%c0, %c0_1, %c0_2, %c0_3] : memref<1x1x8x8xbf16, #tpu.memory_space<vmem>>, vector<1x1x8x8xbf16>
    %4 = vector.shape_cast %3 : vector<1x1x8x8xbf16> to vector<8x8xbf16>
    %5 = arith.extf %4 : vector<8x8xbf16> to vector<8x8xf32>
    %cst = arith.constant 0.353553385 : f32
    %6 = vector.broadcast %cst : f32 to vector<8x8xf32>
    %7 = arith.mulf %5, %6 : vector<8x8xf32>
    %8 = arith.truncf %7 : vector<8x8xf32> to vector<8x8xbf16>
    %c0_4 = arith.constant 0 : index
    %c0_5 = arith.constant 0 : index
    %c0_6 = arith.constant 0 : index
    %c0_7 = arith.constant 0 : index
    %9 = vector.load %arg5[%c0_4, %c0_5, %c0_6, %c0_7] : memref<1x1x8x8xbf16, #tpu.memory_space<vmem>>, vector<1x1x8x8xbf16>
    %10 = vector.shape_cast %9 : vector<1x1x8x8xbf16> to vector<8x8xbf16>
    %c0_8 = arith.constant 0 : index
    %c0_9 = arith.constant 0 : index
    %c0_10 = arith.constant 0 : index
    %c0_11 = arith.constant 0 : index
    %11 = vector.load %arg6[%c0_8, %c0_9, %c0_10, %c0_11] : memref<1x1x8x8xbf16, #tpu.memory_space<vmem>>, vector<1x1x8x8xbf16>
    %12 = vector.shape_cast %11 : vector<1x1x8x8xbf16> to vector<8x8xbf16>
    %cst_12 = arith.constant dense<0.000000e+00> : vector<8x8xf32>
    %13 = tpu.matmul %8, %10, %cst_12 {dimension_numbers = #tpu.dot_dimension_numbers<[1], [1], [0], [0], [0, 0, 1, 0], [], []>} : vector<8x8xbf16>, vector<8x8xbf16>, vector<8x8xf32> -> vector<8x8xf32>
    %c0_13 = arith.constant 0 : index
    %c0_14 = arith.constant 0 : index
    %14 = vector.load %arg9[%c0_13, %c0_14] : memref<8x1xf32, #tpu.memory_space<vmem>>, vector<8x1xf32>
    %cst_15 = arith.constant dense<0xFF800000> : vector<8xf32>
    %15 = vector.multi_reduction <maximumf>, %13, %cst_15 [1] : vector<8x8xf32> to vector<8xf32>
    %16 = vector.shape_cast %15 : vector<8xf32> to vector<8x1xf32>
    %17 = arith.maximumf %14, %16 : vector<8x1xf32>
    %18 = arith.subf %14, %17 : vector<8x1xf32>
    %19 = math.exp %18 : vector<8x1xf32>
    %20 = vector.broadcast %17 : vector<8x1xf32> to vector<8x8xf32>
    %21 = arith.subf %13, %20 : vector<8x8xf32>
    %22 = math.exp %21 : vector<8x8xf32>
    %c0_16 = arith.constant 0 : index
    %c0_17 = arith.constant 0 : index
    %23 = vector.load %arg10[%c0_16, %c0_17] : memref<8x1xf32, #tpu.memory_space<vmem>>, vector<8x1xf32>
    %24 = arith.mulf %19, %23 : vector<8x1xf32>
    %cst_18 = arith.constant dense<0.000000e+00> : vector<8xf32>
    %25 = vector.multi_reduction <add>, %22, %cst_18 [1] : vector<8x8xf32> to vector<8xf32>
    %26 = vector.shape_cast %25 : vector<8xf32> to vector<8x1xf32>
    %27 = arith.addf %24, %26 : vector<8x1xf32>
    %c0_19 = arith.constant 0 : index
    %c0_20 = arith.constant 0 : index
    %28 = vector.load %arg10[%c0_19, %c0_20] : memref<8x1xf32, #tpu.memory_space<vmem>>, vector<8x1xf32>
    tpu.vector_store %arg10[%c0_19, %c0_20], %27 {strides = array<i32>} : memref<8x1xf32, #tpu.memory_space<vmem>>, vector<8x1xf32>,
    %c0_21 = arith.constant 0 : index
    %c0_22 = arith.constant 0 : index
    %29 = vector.load %arg11[%c0_21, %c0_22] : memref<8x8xf32, #tpu.memory_space<vmem>>, vector<8x8xf32>
    %30 = vector.broadcast %19 : vector<8x1xf32> to vector<8x8xf32>
    %31 = arith.mulf %30, %29 : vector<8x8xf32>
    %32 = arith.truncf %22 : vector<8x8xf32> to vector<8x8xbf16>
    %cst_23 = arith.constant dense<0.000000e+00> : vector<8x8xf32>
    %33 = tpu.matmul %32, %12, %cst_23 {dimension_numbers = #tpu.dot_dimension_numbers<[1], [0], [0], [1], [0, 0, 1, 1], [], []>} : vector<8x8xbf16>, vector<8x8xbf16>, vector<8x8xf32> -> vector<8x8xf32>
    %34 = arith.addf %31, %33 : vector<8x8xf32>
    %c0_24 = arith.constant 0 : index
    %c0_25 = arith.constant 0 : index
    %35 = vector.load %arg11[%c0_24, %c0_25] : memref<8x8xf32, #tpu.memory_space<vmem>>, vector<8x8xf32>
    tpu.vector_store %arg11[%c0_24, %c0_25], %34 {strides = array<i32>} : memref<8x8xf32, #tpu.memory_space<vmem>>, vector<8x8xf32>,
    %c0_26 = arith.constant 0 : index
    %c0_27 = arith.constant 0 : index
    %36 = vector.load %arg9[%c0_26, %c0_27] : memref<8x1xf32, #tpu.memory_space<vmem>>, vector<8x1xf32>
    tpu.vector_store %arg9[%c0_26, %c0_27], %17 {strides = array<i32>} : memref<8x1xf32, #tpu.memory_space<vmem>>, vector<8x1xf32>,
    %c0_i32_28 = arith.constant 0 : i32
    %37 = arith.cmpi eq, %arg3, %c0_i32_28 : i32
    %38 = arith.extui %37 : i1 to i32
    %c0_i32_29 = arith.constant 0 : i32
    %39 = arith.cmpi ne, %38, %c0_i32_29 : i32
    scf.if %39 {
      %c0_30 = arith.constant 0 : index
      %c0_31 = arith.constant 0 : index
      %40 = vector.load %arg11[%c0_30, %c0_31] : memref<8x8xf32, #tpu.memory_space<vmem>>, vector<8x8xf32>
      %c0_32 = arith.constant 0 : index
      %c0_33 = arith.constant 0 : index
      %41 = vector.load %arg10[%c0_32, %c0_33] : memref<8x1xf32, #tpu.memory_space<vmem>>, vector<8x1xf32>
      %42 = vector.broadcast %41 : vector<8x1xf32> to vector<8x8xf32>
      %43 = arith.divf %40, %42 : vector<8x8xf32>
      %44 = arith.truncf %43 : vector<8x8xf32> to vector<8x8xbf16>
      %c0_34 = arith.constant 0 : index
      %c0_35 = arith.constant 0 : index
      %c0_36 = arith.constant 0 : index
      %c0_37 = arith.constant 0 : index
      %45 = vector.load %arg8[%c0_34, %c0_35, %c0_36, %c0_37] : memref<1x1x8x8xbf16, #tpu.memory_space<vmem>>, vector<1x1x8x8xbf16>
      %46 = vector.shape_cast %45 : vector<1x1x8x8xbf16> to vector<8x8xbf16>
      %47 = vector.shape_cast %44 : vector<8x8xbf16> to vector<1x1x8x8xbf16>
      tpu.vector_store %arg8[%c0_34, %c0_35, %c0_36, %c0_37], %47 {strides = array<i32>} : memref<1x1x8x8xbf16, #tpu.memory_space<vmem>>, vector<1x1x8x8xbf16>,
    } else {
    }
    return
  }
  func.func @transform_0(%arg0: i32, %arg1: i32, %arg2: i32, %arg3: i32) -> (i32, i32, i32, i32) {
    %c0_i32 = arith.constant 0 : i32
    %c0_i32_0 = arith.constant 0 : i32
    return %arg0, %arg1, %arg2, %c0_i32 : i32, i32, i32, i32
  }
  func.func @transform_1(%arg0: i32, %arg1: i32, %arg2: i32, %arg3: i32) -> (i32, i32, i32, i32) {
    %c0_i32 = arith.constant 0 : i32
    %c0_i32_0 = arith.constant 0 : i32
    return %arg0, %arg1, %arg3, %c0_i32 : i32, i32, i32, i32
  }
  func.func @transform_2(%arg0: i32, %arg1: i32, %arg2: i32, %arg3: i32) -> (i32, i32, i32, i32) {
    %c0_i32 = arith.constant 0 : i32
    %c0_i32_0 = arith.constant 0 : i32
    return %arg0, %arg1, %arg3, %c0_i32 : i32, i32, i32, i32
  }
  func.func @transform_3(%arg0: i32, %arg1: i32, %arg2: i32, %arg3: i32) -> (i32, i32) {
    %c0_i32 = arith.constant 0 : i32
    %c0_i32_0 = arith.constant 0 : i32
    %c0_i32_1 = arith.constant 0 : i32
    return %c0_i32, %c0_i32_0 : i32, i32
  }
  func.func @transform_4(%arg0: i32, %arg1: i32, %arg2: i32, %arg3: i32) -> (i32, i32, i32, i32) {
    %c0_i32 = arith.constant 0 : i32
    %c0_i32_0 = arith.constant 0 : i32
    return %arg0, %arg1, %arg2, %c0_i32 : i32, i32, i32, i32
  }
}

module attributes {stable_mosaic.version = 11 : i64} {
  func.func @_matmul_kernel(%arg0: i32, %arg1: i32, %arg2: i32, %arg3: memref<16x32xbf16, #tpu.memory_space<vmem>>, %arg4: memref<32x64xbf16, #tpu.memory_space<vmem>>, %arg5: memref<1x64xbf16, #tpu.memory_space<vmem>>, %arg6: memref<16x64xbf16, #tpu.memory_space<vmem>>, %arg7: memref<16x64xf32, #tpu.memory_space<vmem>>) attributes {dimension_semantics = [#tpu.dimension_semantics<parallel>, #tpu.dimension_semantics<parallel>, #tpu.dimension_semantics<arbitrary>], iteration_bounds = array<i64: 1, 1, 1>, scalar_prefetch = 0 : i64, scratch_operands = 1 : i64, tpu.core_type = #tpu.core_type<tc>, window_params = [{transform_indices = @transform_0, window_bounds = array<i64: 16, 32>}, {transform_indices = @transform_1, window_bounds = array<i64: 32, 64>}, {transform_indices = @transform_2, window_bounds = array<i64: 1, 64>}, {transform_indices = @transform_3, window_bounds = array<i64: 16, 64>}]} {
    %c0_i32 = arith.constant 0 : i32
    %0 = arith.cmpi eq, %arg2, %c0_i32 : i32
    %1 = arith.extui %0 : i1 to i32
    %c0_i32_0 = arith.constant 0 : i32
    %2 = arith.cmpi ne, %1, %c0_i32_0 : i32
    scf.if %2 {
      %cst_10 = arith.constant 0.000000e+00 : f32
      %12 = vector.broadcast %cst_10 : f32 to vector<16x64xf32>
      %c0_11 = arith.constant 0 : index
      %c0_12 = arith.constant 0 : index
      %13 = vector.load %arg7[%c0_11, %c0_12] : memref<16x64xf32, #tpu.memory_space<vmem>>, vector<16x64xf32>
      tpu.vector_store %arg7[%c0_11, %c0_12], %12 {strides = array<i32>} : memref<16x64xf32, #tpu.memory_space<vmem>>, vector<16x64xf32>,
    } else {
    }
    %c0 = arith.constant 0 : index
    %c0_1 = arith.constant 0 : index
    %3 = vector.load %arg7[%c0, %c0_1] : memref<16x64xf32, #tpu.memory_space<vmem>>, vector<16x64xf32>
    %c0_2 = arith.constant 0 : index
    %c0_3 = arith.constant 0 : index
    %4 = vector.load %arg3[%c0_2, %c0_3] : memref<16x32xbf16, #tpu.memory_space<vmem>>, vector<16x32xbf16>
    %c0_4 = arith.constant 0 : index
    %c0_5 = arith.constant 0 : index
    %5 = vector.load %arg4[%c0_4, %c0_5] : memref<32x64xbf16, #tpu.memory_space<vmem>>, vector<32x64xbf16>
    %cst = arith.constant dense<0.000000e+00> : vector<16x64xf32>
    %6 = tpu.matmul %4, %5, %cst {dimension_numbers = #tpu.dot_dimension_numbers<[1], [0], [0], [1], [0, 0, 1, 1], [], []>} : vector<16x32xbf16>, vector<32x64xbf16>, vector<16x64xf32> -> vector<16x64xf32>
    %7 = arith.addf %3, %6 : vector<16x64xf32>
    %c0_6 = arith.constant 0 : index
    %c0_7 = arith.constant 0 : index
    %8 = vector.load %arg7[%c0_6, %c0_7] : memref<16x64xf32, #tpu.memory_space<vmem>>, vector<16x64xf32>
    tpu.vector_store %arg7[%c0_6, %c0_7], %7 {strides = array<i32>} : memref<16x64xf32, #tpu.memory_space<vmem>>, vector<16x64xf32>,
    %c0_i32_8 = arith.constant 0 : i32
    %9 = arith.cmpi eq, %arg2, %c0_i32_8 : i32
    %10 = arith.extui %9 : i1 to i32
    %c0_i32_9 = arith.constant 0 : i32
    %11 = arith.cmpi ne, %10, %c0_i32_9 : i32
    scf.if %11 {
      %c0_10 = arith.constant 0 : index
      %c0_11 = arith.constant 0 : index
      %12 = vector.load %arg7[%c0_10, %c0_11] : memref<16x64xf32, #tpu.memory_space<vmem>>, vector<16x64xf32>
      %c0_12 = arith.constant 0 : index
      %c0_13 = arith.constant 0 : index
      %13 = vector.load %arg5[%c0_12, %c0_13] : memref<1x64xbf16, #tpu.memory_space<vmem>>, vector<1x64xbf16>
      %14 = arith.extf %13 : vector<1x64xbf16> to vector<1x64xf32>
      %15 = vector.broadcast %14 : vector<1x64xf32> to vector<16x64xf32>
      %16 = arith.addf %12, %15 : vector<16x64xf32>
      %cst_14 = arith.constant 5.000000e-01 : f32
      %17 = vector.broadcast %cst_14 : f32 to vector<16x64xf32>
      %18 = arith.mulf %17, %16 : vector<16x64xf32>
      %cst_15 = arith.constant 4.471500e-02 : f32
      %19 = vector.broadcast %cst_15 : f32 to vector<16x64xf32>
      %20 = arith.mulf %19, %16 : vector<16x64xf32>
      %21 = arith.mulf %20, %16 : vector<16x64xf32>
      %22 = arith.mulf %21, %16 : vector<16x64xf32>
      %23 = arith.addf %16, %22 : vector<16x64xf32>
      %cst_16 = arith.constant 0.797884583 : f32
      %24 = vector.broadcast %cst_16 : f32 to vector<16x64xf32>
      %25 = arith.mulf %24, %23 : vector<16x64xf32>
      %26 = math.tanh %25 : vector<16x64xf32>
      %cst_17 = arith.constant 1.000000e+00 : f32
      %27 = vector.broadcast %cst_17 : f32 to vector<16x64xf32>
      %28 = arith.addf %27, %26 : vector<16x64xf32>
      %29 = arith.mulf %18, %28 : vector<16x64xf32>
      %30 = arith.truncf %29 : vector<16x64xf32> to vector<16x64xbf16>
      %c0_18 = arith.constant 0 : index
      %c0_19 = arith.constant 0 : index
      %31 = vector.load %arg6[%c0_18, %c0_19] : memref<16x64xbf16, #tpu.memory_space<vmem>>, vector<16x64xbf16>
      tpu.vector_store %arg6[%c0_18, %c0_19], %30 {strides = array<i32>} : memref<16x64xbf16, #tpu.memory_space<vmem>>, vector<16x64xbf16>,
    } else {
    }
    return
  }
  func.func @transform_0(%arg0: i32, %arg1: i32, %arg2: i32) -> (i32, i32) {
    %c0_i32 = arith.constant 0 : i32
    return %arg0, %arg2 : i32, i32
  }
  func.func @transform_1(%arg0: i32, %arg1: i32, %arg2: i32) -> (i32, i32) {
    %c0_i32 = arith.constant 0 : i32
    return %arg2, %arg1 : i32, i32
  }
  func.func @transform_2(%arg0: i32, %arg1: i32, %arg2: i32) -> (i32, i32) {
    %c0_i32 = arith.constant 0 : i32
    %c0_i32_0 = arith.constant 0 : i32
    return %c0_i32, %arg1 : i32, i32
  }
  func.func @transform_3(%arg0: i32, %arg1: i32, %arg2: i32) -> (i32, i32) {
    %c0_i32 = arith.constant 0 : i32
    return %arg0, %arg1 : i32, i32
  }
}

module attributes {stable_mosaic.version = 11 : i64} {
  func.func @_matmul_add_ln_kernel(%arg0: i32, %arg1: i32, %arg2: memref<16x64xbf16, #tpu.memory_space<vmem>>, %arg3: memref<64x32xbf16, #tpu.memory_space<vmem>>, %arg4: memref<1x32xbf16, #tpu.memory_space<vmem>>, %arg5: memref<16x32xbf16, #tpu.memory_space<vmem>>, %arg6: memref<1x32xbf16, #tpu.memory_space<vmem>>, %arg7: memref<1x32xbf16, #tpu.memory_space<vmem>>, %arg8: memref<16x32xbf16, #tpu.memory_space<vmem>>, %arg9: memref<16x32xf32, #tpu.memory_space<vmem>>) attributes {dimension_semantics = [#tpu.dimension_semantics<parallel>, #tpu.dimension_semantics<arbitrary>], iteration_bounds = array<i64: 1, 1>, scalar_prefetch = 0 : i64, scratch_operands = 1 : i64, tpu.core_type = #tpu.core_type<tc>, window_params = [{transform_indices = @transform_0, window_bounds = array<i64: 16, 64>}, {transform_indices = @transform_1, window_bounds = array<i64: 64, 32>}, {pipeline_mode = #tpu.pipeline_mode<synchronous>, transform_indices = @transform_2, window_bounds = array<i64: 1, 32>}, {transform_indices = @transform_3, window_bounds = array<i64: 16, 32>}, {pipeline_mode = #tpu.pipeline_mode<synchronous>, transform_indices = @transform_4, window_bounds = array<i64: 1, 32>}, {pipeline_mode = #tpu.pipeline_mode<synchronous>, transform_indices = @transform_5, window_bounds = array<i64: 1, 32>}, {transform_indices = @transform_6, window_bounds = array<i64: 16, 32>}]} {
    %c0_i32 = arith.constant 0 : i32
    %0 = arith.cmpi eq, %arg1, %c0_i32 : i32
    %1 = arith.extui %0 : i1 to i32
    %c0_i32_0 = arith.constant 0 : i32
    %2 = arith.cmpi ne, %1, %c0_i32_0 : i32
    scf.if %2 {
      %cst_10 = arith.constant 0.000000e+00 : f32
      %12 = vector.broadcast %cst_10 : f32 to vector<16x32xf32>
      %c0_11 = arith.constant 0 : index
      %c0_12 = arith.constant 0 : index
      %13 = vector.load %arg9[%c0_11, %c0_12] : memref<16x32xf32, #tpu.memory_space<vmem>>, vector<16x32xf32>
      tpu.vector_store %arg9[%c0_11, %c0_12], %12 {strides = array<i32>} : memref<16x32xf32, #tpu.memory_space<vmem>>, vector<16x32xf32>,
    } else {
    }
    %c0 = arith.constant 0 : index
    %c0_1 = arith.constant 0 : index
    %3 = vector.load %arg9[%c0, %c0_1] : memref<16x32xf32, #tpu.memory_space<vmem>>, vector<16x32xf32>
    %c0_2 = arith.constant 0 : index
    %c0_3 = arith.constant 0 : index
    %4 = vector.load %arg2[%c0_2, %c0_3] : memref<16x64xbf16, #tpu.memory_space<vmem>>, vector<16x64xbf16>
    %c0_4 = arith.constant 0 : index
    %c0_5 = arith.constant 0 : index
    %5 = vector.load %arg3[%c0_4, %c0_5] : memref<64x32xbf16, #tpu.memory_space<vmem>>, vector<64x32xbf16>
    %cst = arith.constant dense<0.000000e+00> : vector<16x32xf32>
    %6 = tpu.matmul %4, %5, %cst {dimension_numbers = #tpu.dot_dimension_numbers<[1], [0], [0], [1], [0, 0, 1, 1], [], []>} : vector<16x64xbf16>, vector<64x32xbf16>, vector<16x32xf32> -> vector<16x32xf32>
    %7 = arith.addf %3, %6 : vector<16x32xf32>
    %c0_6 = arith.constant 0 : index
    %c0_7 = arith.constant 0 : index
    %8 = vector.load %arg9[%c0_6, %c0_7] : memref<16x32xf32, #tpu.memory_space<vmem>>, vector<16x32xf32>
    tpu.vector_store %arg9[%c0_6, %c0_7], %7 {strides = array<i32>} : memref<16x32xf32, #tpu.memory_space<vmem>>, vector<16x32xf32>,
    %c0_i32_8 = arith.constant 0 : i32
    %9 = arith.cmpi eq, %arg1, %c0_i32_8 : i32
    %10 = arith.extui %9 : i1 to i32
    %c0_i32_9 = arith.constant 0 : i32
    %11 = arith.cmpi ne, %10, %c0_i32_9 : i32
    scf.if %11 {
      %c0_10 = arith.constant 0 : index
      %c0_11 = arith.constant 0 : index
      %12 = vector.load %arg9[%c0_10, %c0_11] : memref<16x32xf32, #tpu.memory_space<vmem>>, vector<16x32xf32>
      %c0_12 = arith.constant 0 : index
      %c0_13 = arith.constant 0 : index
      %13 = vector.load %arg4[%c0_12, %c0_13] : memref<1x32xbf16, #tpu.memory_space<vmem>>, vector<1x32xbf16>
      %14 = arith.extf %13 : vector<1x32xbf16> to vector<1x32xf32>
      %15 = vector.broadcast %14 : vector<1x32xf32> to vector<16x32xf32>
      %16 = arith.addf %12, %15 : vector<16x32xf32>
      %c0_14 = arith.constant 0 : index
      %c0_15 = arith.constant 0 : index
      %17 = vector.load %arg5[%c0_14, %c0_15] : memref<16x32xbf16, #tpu.memory_space<vmem>>, vector<16x32xbf16>
      %18 = arith.extf %17 : vector<16x32xbf16> to vector<16x32xf32>
      %19 = arith.addf %16, %18 : vector<16x32xf32>
      %cst_16 = arith.constant dense<0.000000e+00> : vector<16xf32>
      %20 = vector.multi_reduction <add>, %19, %cst_16 [1] : vector<16x32xf32> to vector<16xf32>
      %21 = vector.shape_cast %20 : vector<16xf32> to vector<16x1xf32>
      %cst_17 = arith.constant 3.200000e+01 : f32
      %22 = vector.broadcast %cst_17 : f32 to vector<16x1xf32>
      %23 = arith.divf %21, %22 : vector<16x1xf32>
      %24 = vector.broadcast %23 : vector<16x1xf32> to vector<16x32xf32>
      %25 = arith.subf %19, %24 : vector<16x32xf32>
      %26 = arith.mulf %25, %25 : vector<16x32xf32>
      %cst_18 = arith.constant dense<0.000000e+00> : vector<16xf32>
      %27 = vector.multi_reduction <add>, %26, %cst_18 [1] : vector<16x32xf32> to vector<16xf32>
      %28 = vector.shape_cast %27 : vector<16xf32> to vector<16x1xf32>
      %cst_19 = arith.constant 3.200000e+01 : f32
      %29 = vector.broadcast %cst_19 : f32 to vector<16x1xf32>
      %30 = arith.divf %28, %29 : vector<16x1xf32>
      %cst_20 = arith.constant 9.99999974E-6 : f32
      %31 = vector.broadcast %cst_20 : f32 to vector<16x1xf32>
      %32 = arith.addf %30, %31 : vector<16x1xf32>
      %33 = math.rsqrt %32 : vector<16x1xf32>
      %34 = vector.broadcast %33 : vector<16x1xf32> to vector<16x32xf32>
      %35 = arith.mulf %25, %34 : vector<16x32xf32>
      %c0_21 = arith.constant 0 : index
      %c0_22 = arith.constant 0 : index
      %36 = vector.load %arg6[%c0_21, %c0_22] : memref<1x32xbf16, #tpu.memory_space<vmem>>, vector<1x32xbf16>
      %37 = arith.extf %36 : vector<1x32xbf16> to vector<1x32xf32>
      %38 = vector.broadcast %37 : vector<1x32xf32> to vector<16x32xf32>
      %39 = arith.mulf %35, %38 : vector<16x32xf32>
      %c0_23 = arith.constant 0 : index
      %c0_24 = arith.constant 0 : index
      %40 = vector.load %arg7[%c0_23, %c0_24] : memref<1x32xbf16, #tpu.memory_space<vmem>>, vector<1x32xbf16>
      %41 = arith.extf %40 : vector<1x32xbf16> to vector<1x32xf32>
      %42 = vector.broadcast %41 : vector<1x32xf32> to vector<16x32xf32>
      %43 = arith.addf %39, %42 : vector<16x32xf32>
      %44 = arith.truncf %43 : vector<16x32xf32> to vector<16x32xbf16>
      %c0_25 = arith.constant 0 : index
      %c0_26 = arith.constant 0 : index
      %45 = vector.load %arg8[%c0_25, %c0_26] : memref<16x32xbf16, #tpu.memory_space<vmem>>, vector<16x32xbf16>
      tpu.vector_store %arg8[%c0_25, %c0_26], %44 {strides = array<i32>} : memref<16x32xbf16, #tpu.memory_space<vmem>>, vector<16x32xbf16>,
    } else {
    }
    return
  }
  func.func @transform_0(%arg0: i32, %arg1: i32) -> (i32, i32) {
    %c0_i32 = arith.constant 0 : i32
    return %arg0, %arg1 : i32, i32
  }
  func.func @transform_1(%arg0: i32, %arg1: i32) -> (i32, i32) {
    %c0_i32 = arith.constant 0 : i32
    %c0_i32_0 = arith.constant 0 : i32
    return %arg1, %c0_i32 : i32, i32
  }
  func.func @transform_2(%arg0: i32, %arg1: i32) -> (i32, i32) {
    %c0_i32 = arith.constant 0 : i32
    %c0_i32_0 = arith.constant 0 : i32
    %c0_i32_1 = arith.constant 0 : i32
    return %c0_i32, %c0_i32_0 : i32, i32
  }
  func.func @transform_3(%arg0: i32, %arg1: i32) -> (i32, i32) {
    %c0_i32 = arith.constant 0 : i32
    %c0_i32_0 = arith.constant 0 : i32
    return %arg0, %c0_i32 : i32, i32
  }
  func.func @transform_4(%arg0: i32, %arg1: i32) -> (i32, i32) {
    %c0_i32 = arith.constant 0 : i32
    %c0_i32_0 = arith.constant 0 : i32
    %c0_i32_1 = arith.constant 0 : i32
    return %c0_i32, %c0_i32_0 : i32, i32
  }
  func.func @transform_5(%arg0: i32, %arg1: i32) -> (i32, i32) {
    %c0_i32 = arith.constant 0 : i32
    %c0_i32_0 = arith.constant 0 : i32
    %c0_i32_1 = arith.constant 0 : i32
    return %c0_i32, %c0_i32_0 : i32, i32
  }
  func.func @transform_6(%arg0: i32, %arg1: i32) -> (i32, i32) {
    %c0_i32 = arith.constant 0 : i32
    %c0_i32_0 = arith.constant 0 : i32
    return %arg0, %c0_i32 : i32, i32
  }
}

</mosaic_0001>

<bundles_post_ra>
// kernel: fwd.9
= control target key start
LH: loop header
LB: loop body
LE: loop exit
PB: predicated region body
PF: predicated region fallthrough
CT: control target
= control target key end

     0   :  { %vm19_vm0 = vcmask 785408   ;;  %v149_v0 = vmov 0.0   ;;  %vm150_vm1 = vmmov 0   ;;  %vm47_vm2 = vcmask 261120   ;;  %s193_s1 = inlined_call_operand.vmem [shape: bf16[32,96], index: 1, kind: input, shape index: {}]   ;;  %s194_s0 = inlined_call_operand.vmem [shape: bf16[16,32], index: 0, kind: input, shape index: {}]   ;;  %s195_s2 = inlined_call_operand.vmem [shape: bf16[1,96], index: 2, kind: input, shape index: {}]   ;;  %s196_s3 = inlined_call_operand.vmem [shape: bf16[16,96], index: 3, kind: output, shape index: {}]  }
   0x1   :  { %136 = vmatprep.subr.bf16.mxu0 %v149_v0  ;;  %v146_v1 = vld [vmem:[%s193_s1] sm:$0xff]   ;;  %140 = vmatprep.mubr.msk.bf16.mxu0 %vm150_vm1, %v149_v0  ;;  %20 = vst.msk [vmem:[#allocation2] sm:$0xff] %vm19_vm0, %v149_v0  ;;  %21 = vst.msk [vmem:[#allocation2 + $0x8] sm:$0xff] %vm19_vm0, %v149_v0  ;;  %v147_v2 = vld [vmem:[%s193_s1 + $0x8] sm:$0xff]   ;;  %v104_v4 = vlaneseq  ;;  %vm118_vm3 = vcmask 781312  }
   0x2   :  { %137 = vmatpush3.bf16.msra.mxu0 %v146_v1  ;;  %v148_v3 = vld [vmem:[%s194_s0] sm:$0xff]  }
   0x3   :  { %138 = vmatprep.subr.bf16.mxu0 %v149_v0  ;;  %v105_v6 = vshrl.u32 %v104_v4, 7  ;;  %v102_v8 = vld [vmem:[%s195_s2] sm:$0x1] }
   0x4   :  { %v103_v13 = vunpack.c.l.bf16 %v102_v8 }
   0x5   :  { %v106_v14 = vsub.s32 0, %v105_v6 }
   0x6   :  { %139 = vmatpush3.bf16.msra.mxu0 %v147_v2 }
   0x7   :  { %v107_v17 = vrot.slane %v103_v13, %v106_v14 }
   0x8   :  { %v22_v5 = vld [vmem:[#allocation2] sm:$0xff]  ;;  %v23_v9 = vld [vmem:[#allocation2 + $0x8] sm:$0xff] }
   0x9   :  { %141 = vmatmul.mubr.msk.bf16.vlgmr.msra.gmra.mrb[0].mxu0 %vm47_vm2, %v148_v3 }
  0xdc   :  { %v85_v7 = vpop.f32.mrb[0].mxu0 }
  0xdd   :  { %v92_v10 = vadd.f32 %v85_v7, %v22_v5  ;;  %v142_v11 = vpop.f32.mrb[1].mxu0 }
  0xde   :  { %v88_v12 = vpop.f32.mrb[2].mxu0 }
  0xdf   :  { %95 = vst.msk [vmem:[#allocation2] sm:$0xff] %vm19_vm0, %v92_v10  ;;  %v93_v15 = vadd.f32 %v88_v12, %v23_v9  ;;  %v143_v16 = vpop.f32.mrb[3].mxu0 }
  0xe1   :  { %96 = vst.msk [vmem:[#allocation2 + $0x8] sm:$0xff] %vm19_vm0, %v93_v15 }
  0xe6   :  { %v100_v18 = vld [vmem:[#allocation2] sm:$0xff] }
  0xe7   :  { %v108_v19 = vadd.f32 %v107_v17, %v100_v18 }
  0xe8   :  { %v101_v20 = vld [vmem:[#allocation2 + $0x8] sm:$0xff] }
  0xe9   :  { %v131_v21 = vpack.c.bf16 %v108_v19, %v108_v19  ;;  %v109_v22 = vadd.f32 %v107_v17, %v101_v20 }
  0xeb   :  { %119 = vst.msk [vmem:[%s196_s3] sm:$0xf] %vm118_vm3, %v131_v21  ;;  %v132_v23 = vpack.c.bf16 %v109_v22, %v109_v22 }
  0xed   :  { %120 = vst.msk [vmem:[%s196_s3 + $0x4] sm:$0xf] %vm118_vm3, %v132_v23 }

// kernel: fwd.10
= control target key start
LH: loop header
LB: loop body
LE: loop exit
PB: predicated region body
PF: predicated region fallthrough
CT: control target
= control target key end

     0   :  { %s856_s15 = smov 0   ;;  %s858_s16 = smov 0   ;;  %s933_s0 = inlined_call_operand.vmem [shape: bf16[2,4,8,8], index: 0, kind: input, shape index: {}]   ;;  %s934_s1 = inlined_call_operand.vmem [shape: bf16[2,4,8,8], index: 1, kind: input, shape index: {}]   ;;  %s935_s2 = inlined_call_operand.vmem [shape: bf16[2,4,8,8], index: 2, kind: input, shape index: {}]   ;;  %s936_s3 = inlined_call_operand.vmem [shape: f32[8,8], index: 3, kind: input, shape index: {}]   ;;  %s937_s4 = inlined_call_operand.vmem [shape: bf16[2,4,8,8], index: 4, kind: output, shape index: {}]  }
   0x1   :  { %s860_s17 = smov 0   ;;  %s862_s18 = smov 0  }
   0x2   :  { %s864_s19 = smov 0  }
   0x3 LB: > { %s36_s20 = sadd.s32 1, %s817_s17  ;;  %s40_s21 = sadd.s32 1, %s821_s18  ;;  %s825_s19 = sphi %s864_s19, %s14_s19   ;;  %s821_s18 = sphi %s862_s18, %s941_s18   ;;  %s817_s17 = sphi %s860_s17, %s940_s17   ;;  %s813_s16 = sphi %s858_s16, %s939_s16   ;;  %s809_s15 = sphi %s856_s15, %s938_s15  }
   0x4   : > { %p38_p0 = scmp.ge.s32.totalorder %s36_s20, 4  ;;  %p706_p1 = scmp.ge.s32.totalorder %s825_s19, 1 }
   0x5   : > { %p256_p2 = scmp.lt.s32.totalorder %s825_s19, 9 }
   0x6   : > { %s943_s20 = smov (%p38_p0, %s36_s20), 0  ;;  %s945_s21 = smov (!%p38_p0, %s40_s21), %s821_s18 }
   0x7   : > { %p257_p3 = pnand %p706_p1, %p256_p2  ;;  %p42_p4 = scmp.ge.s32.totalorder %s945_s21, 2 }
   0x8   : > { %p323_p5 = scmp.lt.s32.totalorder (!%p257_p3), %s813_s16, 1  ;;  %p325_p6 = scmp.lt.s32.totalorder (!%p257_p3), %s809_s15, 3  ;;  %vm382_vm0 = vcmask (!%p257_p3), 64512   ;;  %v827_v0 = vmov (!%p257_p3), 0.0   ;;  %vm828_vm1 = vmmov (!%p257_p3), 0   ;;  %vm379_vm2 = vcmask (!%p257_p3), 7168  }
   0x9   : > { %s947_s21 = smov (%p42_p4, %s945_s21), 0  ;;  %260 = sbr.rel (%p257_p3) target bundleno = 829 (0x33d), region = 36 }
   0xa   : > { %723 = vmatprep.subr.bf16.mxu0 (!%p257_p3), %v827_v0  ;;  %383 = vst.msk [vmem:[#allocation4] sm:$0xff] (!%p257_p3), %vm382_vm0, %v827_v0  ;;  %725 = vmatprep.mubr.msk.bf16.mxu0 (!%p257_p3), %vm828_vm1, %v827_v0  ;;  %v829_v7 = vmov (!%p257_p3), -inf   ;;  %v390_v8 = vld [vmem:[%s936_s3] sm:$0xff] (!%p257_p3)  ;;  %v830_v15 = vmov (!%p257_p3), 0   ;;  %vm473_vm3 = vcmask (!%p257_p3), 1043456   ;;  %vm533_vm4 = vcmask (!%p257_p3), 60416  }
   0xb   : > { %729 = vmatprep.subr.bf16.mxu1 (!%p257_p3), %v827_v0  ;;  %731 = vmatprep.mubr.msk.bf16.mxu1 (!%p257_p3), %vm828_vm1, %v827_v0  ;;  %380 = vst.msk [vmem:[#allocation2] sm:$0xff] (!%p257_p3), %vm379_vm2, %v829_v7  ;;  %381 = vst.msk [vmem:[#allocation3] sm:$0xff] (!%p257_p3), %vm379_vm2, %v827_v0 }
   0xc   : > { %779 = vset.pattern.permute.xlu0 (!%p257_p3), %v830_v15  ;;  %780 = vset.pattern.permute.xlu1 (!%p257_p3), %v830_v15 }
  0x10   : > { %s949_s16 = smov (!%p323_p5, %s813_s16), 1  ;;  %s951_s15 = smov (!%p325_p6, %s809_s15), 3 }
  0x11   : > { %s707_s22 = sshll.u32 %s949_s16, 2  ;;  %v462_v35 = vld [vmem:[#allocation4] sm:$0xff] }
  0x12   : > { %s331_s23 = sadd.s32 %s707_s22, %s951_s15  ;;  %v438_v16 = vld [vmem:[#allocation2] sm:$0xff]  ;;  %v454_v30 = vld [vmem:[#allocation3] sm:$0xff] }
  0x13   : > { %s887_s24 = sshll.u32 %s331_s23, 2 }
  0x14   : > { %s344_s27 = scalar_lea.vmem %s934_s1, %s887_s24  ;;  %s333_s30 = scalar_lea.vmem %s933_s0, %s887_s24 }
  0x15   : > { %v388_v1 = vld [vmem:[%s344_s27] sm:$0xf]  ;;  %s355_s9 = scalar_lea.vmem %s935_s2, %s887_s24  ;;  %s373_s12 = scalar_lea.vmem %s937_s4, %s887_s24 }
  0x16   : > { %v396_v2 = vsel %vm382_vm0, %v388_v1, 0  ;;  %v384_v3 = vld [vmem:[%s333_s30] sm:$0xf] }
  0x17   : > { %724 = vmatpush3.bf16.xpose.msra.mxu0 %v396_v2  ;;  %v385_v4 = vunpack.c.l.bf16 %v384_v3  ;;  %v389_v20 = vld [vmem:[%s355_s9] sm:$0xf] }
  0x18   : > { %v475_v21 = vsel %vm473_vm3, %v389_v20, 0 }
  0x19   : > { %v386_v5 = vmul.f32 0.35355338, %v385_v4  ;;  %730 = vmatpush3.bf16.msra.mxu1 %v475_v21 }
  0x1b   : > { %v387_v6 = vpack.c.bf16 %v386_v5, %v386_v5 }
  0x1e   : > { %726 = vmatmul.mubr.msk.bf16.vlgmr.msra.gmra.mrb[0].mxu0 %vm382_vm0, %v387_v6 }
  0xf1   : > { %v432_v9 = vpop.f32.mrb[0].mxu0 }
  0xf2   : > { %v433_v10 = vadd.f32 %v432_v9, %v390_v8  ;;  %v727_v11 = vpop.f32.mrb[1].mxu0 }
  0xf3   : > { %v435_v12 = vpop.f32.mrb[2].mxu0 }
  0xf4   : > { %v728_v13 = vpop.f32.mrb[3].mxu0  ;;  %v439_v14 = vsel %vm382_vm0, %v433_v10, -inf }
  0xf5   : > { %440 = vmax.xlane.f32.xlu0 %v439_v14 }
 0x182   : > { %v441_v17 = vpop.xlane.xlu0 %440 }
 0x183   : > { %v442_v18 = vmax.f32 %v438_v16, %v441_v17 }
 0x185   : > { %v443_v19 = vsub.f32 %v438_v16, %v442_v18  ;;  %519 = vst.msk [vmem:[#allocation2] sm:$0xff] %vm379_vm2, %v442_v18  ;;  %448 = vperm.xlu0 %779, %v442_v18  }
 0x187   : > { %v444_v28 = vmul.f32 1.442695, %v443_v19 }
 0x204   : > { %v449_v22 = vpop.permute.xlu0 %448 }
 0x205   : > { %v451_v23 = vsub.f32 %v433_v10, %v449_v22 }
 0x207   : > { %v452_v24 = vmul.f32 1.442695, %v451_v23 }
 0x209   : > { %781 = vpow2.f32 %v452_v24 }
 0x20a   : > { %783 = vpow2.f32 %v444_v28 }
 0x213   : > { %v782_v25 = vpop.eup %781 }
 0x214   : > { %v456_v26 = vsel %vm382_vm0, %v782_v25, 0.0  ;;  %v469_v27 = vpack.c.bf16 %v782_v25, %v782_v25  ;;  %v784_v29 = vpop.eup %783 }
 0x215   : > { %457 = vadd.xlane.f32.xlu1 %v456_v26  ;;  %v455_v31 = vmul.f32 %v784_v29, %v454_v30 }
 0x216   : > { %732 = vmatmul.mubr.msk.bf16.vlgmr.msra.gmra.mrb[0].mxu1 %vm382_vm0, %v469_v27 }
 0x226   : > { %465 = vperm.xlu1 %780, %v784_v29  }
 0x2a2   : > { %v458_v32 = vpop.xlane.xlu1 %457 }
 0x2a3   : > { %v459_v33 = vadd.f32 %v458_v32, %v455_v31 }
 0x2a5   : > { %461 = vst.msk [vmem:[#allocation3] sm:$0xff] %vm379_vm2, %v459_v33 }
 0x2a6   : > { %v466_v36 = vpop.permute.xlu1 %465 }
 0x2a7   : > { %v468_v37 = vmul.f32 %v466_v36, %v462_v35 }
 0x2ac   : > { %v524_v34 = vld [vmem:[#allocation3] sm:$0xff] }
 0x2ad   : > { %527 = vperm.xlu1 %780, %v524_v34  }
 0x2e9   : > { %v511_v38 = vpop.f32.mrb[0].mxu1 }
 0x2ea   : > { %v517_v39 = vadd.f32 %v511_v38, %v468_v37  ;;  %v733_v40 = vpop.f32.mrb[1].mxu1 }
 0x2eb   : > { %v514_v41 = vpop.f32.mrb[2].mxu1 }
 0x2ec   : > { %518 = vst.msk [vmem:[#allocation4] sm:$0xff] %vm382_vm0, %v517_v39  ;;  %v734_v42 = vpop.f32.mrb[3].mxu1 }
 0x2f3   : > { %v523_v45 = vld [vmem:[#allocation4] sm:$0xff] }
 0x32c   : > { %v528_v43 = vpop.permute.xlu1 %527 }
 0x32d   : > { %785 = vrcp.f32 %v528_v43 }
 0x337   : > { %v786_v44 = vpop.eup %785 }
 0x338   : > { %v531_v46 = vmul.f32 %v786_v44, %v523_v45 }
 0x33a   : > { %v532_v47 = vpack.c.bf16 %v531_v46, %v531_v46 }
 0x33c   : > { %534 = vst.msk [vmem:[%s373_s12] sm:$0xf] %vm533_vm4, %v532_v47 }
 0x33d PF: > { %s14_s19 = sadd.s32 1, %s825_s19   ;;  %s938_s15 = smov %s817_s17 }
 0x33e   : > { %p11_p7 = scmp.ge.s32.totalorder %s14_s19, 10   ;;  %s939_s16 = smov %s821_s18 }
 0x33f   : > { %s940_s17 = smov %s943_s20  ;;  %s941_s18 = smov %s947_s21 }
 0x340   :  { %13 = sbr.rel (!%p11_p7) target bundleno = 3 (0x3), region = 83 }

// kernel: fwd.12
= control target key start
LH: loop header
LB: loop body
LE: loop exit
PB: predicated region body
PF: predicated region fallthrough
CT: control target
= control target key end

     0   :  { %vm19_vm0 = vcmask 261120   ;;  %v148_v0 = vmov 0.0   ;;  %vm149_vm1 = vmmov 0   ;;  %v103_v4 = vlaneseq  ;;  %s193_s1 = inlined_call_operand.vmem [shape: bf16[32,32], index: 1, kind: input, shape index: {}]   ;;  %s194_s0 = inlined_call_operand.vmem [shape: bf16[16,32], index: 0, kind: input, shape index: {}]   ;;  %s195_s2 = inlined_call_operand.vmem [shape: bf16[1,32], index: 2, kind: input, shape index: {}]   ;;  %s196_s3 = inlined_call_operand.vmem [shape: bf16[16,32], index: 3, kind: output, shape index: {}]  }
   0x1   :  { %135 = vmatprep.subr.bf16.mxu0 %v148_v0  ;;  %v145_v1 = vld [vmem:[%s193_s1] sm:$0xff]   ;;  %139 = vmatprep.mubr.msk.bf16.mxu0 %vm149_vm1, %v148_v0  ;;  %20 = vst.msk [vmem:[#allocation2] sm:$0xff] %vm19_vm0, %v148_v0  ;;  %21 = vst.msk [vmem:[#allocation2 + $0x8] sm:$0xff] %vm19_vm0, %v148_v0  ;;  %v146_v2 = vld [vmem:[%s193_s1 + $0x8] sm:$0xff]   ;;  %vm117_vm2 = vcmask 257024  }
   0x2   :  { %136 = vmatpush3.bf16.msra.mxu0 %v145_v1  ;;  %v147_v3 = vld [vmem:[%s194_s0] sm:$0xff]   ;;  %v104_v6 = vshrl.u32 %v103_v4, 7 }
   0x3   :  { %137 = vmatprep.subr.bf16.mxu0 %v148_v0  ;;  %v101_v8 = vld [vmem:[%s195_s2] sm:$0x1] }
   0x4   :  { %v102_v13 = vunpack.c.l.bf16 %v101_v8  ;;  %v105_v14 = vsub.s32 0, %v104_v6 }
   0x6   :  { %138 = vmatpush3.bf16.msra.mxu0 %v146_v2  ;;  %v106_v17 = vrot.slane %v102_v13, %v105_v14 }
   0x8   :  { %v22_v5 = vld [vmem:[#allocation2] sm:$0xff]  ;;  %v23_v9 = vld [vmem:[#allocation2 + $0x8] sm:$0xff] }
   0x9   :  { %140 = vmatmul.mubr.msk.bf16.vlgmr.msra.gmra.mrb[0].mxu0 %vm19_vm0, %v147_v3 }
  0xdc   :  { %v85_v7 = vpop.f32.mrb[0].mxu0 }
  0xdd   :  { %v92_v10 = vadd.f32 %v85_v7, %v22_v5  ;;  %v141_v11 = vpop.f32.mrb[1].mxu0 }
  0xde   :  { %v88_v12 = vpop.f32.mrb[2].mxu0 }
  0xdf   :  { %94 = vst.msk [vmem:[#allocation2] sm:$0xff] %vm19_vm0, %v92_v10  ;;  %v93_v15 = vadd.f32 %v88_v12, %v23_v9  ;;  %v142_v16 = vpop.f32.mrb[3].mxu0 }
  0xe1   :  { %95 = vst.msk [vmem:[#allocation2 + $0x8] sm:$0xff] %vm19_vm0, %v93_v15 }
  0xe6   :  { %v99_v18 = vld [vmem:[#allocation2] sm:$0xff] }
  0xe7   :  { %v107_v19 = vadd.f32 %v106_v17, %v99_v18 }
  0xe8   :  { %v100_v20 = vld [vmem:[#allocation2 + $0x8] sm:$0xff] }
  0xe9   :  { %v130_v21 = vpack.c.bf16 %v107_v19, %v107_v19  ;;  %v108_v22 = vadd.f32 %v106_v17, %v100_v20 }
  0xeb   :  { %118 = vst.msk [vmem:[%s196_s3] sm:$0xf] %vm117_vm2, %v130_v21  ;;  %v131_v23 = vpack.c.bf16 %v108_v22, %v108_v22 }
  0xed   :  { %119 = vst.msk [vmem:[%s196_s3 + $0x4] sm:$0xf] %vm117_vm2, %v131_v23 }

// kernel: fwd.11
= control target key start
LH: loop header
LB: loop body
LE: loop exit
PB: predicated region body
PF: predicated region fallthrough
CT: control target
= control target key end

     0   :  { %vm28_vm0 = vcmask 261120   ;;  %v214_v0 = vmov 0.0   ;;  %vm215_vm1 = vmmov 0   ;;  %v112_v4 = vlaneseq  ;;  %s287_s1 = inlined_call_operand.vmem [shape: bf16[32,32], index: 1, kind: input, shape index: {}]   ;;  %s288_s0 = inlined_call_operand.vmem [shape: bf16[16,32], index: 0, kind: input, shape index: {}]   ;;  %s289_s2 = inlined_call_operand.vmem [shape: bf16[1,32], index: 2, kind: input, shape index: {}]   ;;  %s290_s3 = inlined_call_operand.vmem [shape: bf16[16,32], index: 3, kind: input, shape index: {}]   ;;  %s291_s4 = inlined_call_operand.vmem [shape: bf16[1,32], index: 4, kind: input, shape index: {}]   ;;  %s292_s5 = inlined_call_operand.vmem [shape: bf16[1,32], index: 5, kind: input, shape index: {}]   ;;  %s293_s6 = inlined_call_operand.vmem [shape: bf16[16,32], index: 6, kind: output, shape index: {}]  }
   0x1   :  { %197 = vmatprep.subr.bf16.mxu0 %v214_v0  ;;  %v207_v1 = vld [vmem:[%s287_s1] sm:$0xff]   ;;  %201 = vmatprep.mubr.msk.bf16.mxu0 %vm215_vm1, %v214_v0  ;;  %29 = vst.msk [vmem:[#allocation2] sm:$0xff] %vm28_vm0, %v214_v0  ;;  %30 = vst.msk [vmem:[#allocation2 + $0x8] sm:$0xff] %vm28_vm0, %v214_v0  ;;  %v208_v2 = vld [vmem:[%s287_s1 + $0x8] sm:$0xff]   ;;  %vm175_vm2 = vcmask 257024  }
   0x2   :  { %198 = vmatpush3.bf16.msra.mxu0 %v207_v1  ;;  %v209_v3 = vld [vmem:[%s288_s0] sm:$0xff]   ;;  %v113_v6 = vshrl.u32 %v112_v4, 7 }
   0x3   :  { %199 = vmatprep.subr.bf16.mxu0 %v214_v0  ;;  %v110_v9 = vld [vmem:[%s289_s2] sm:$0x1] }
   0x4   :  { %v111_v15 = vunpack.c.l.bf16 %v110_v9  ;;  %v114_v16 = vsub.s32 0, %v113_v6  ;;  %v191_v17 = vld [vmem:[%s290_s3] sm:$0xff]  }
   0x5   :  { %v192_v19 = vunpack.c.l.bf16 %v191_v17  ;;  %v193_v22 = vunpack.c.h.bf16 %v191_v17  ;;  %v151_v44 = vld [vmem:[%s291_s4] sm:$0x1] }
   0x6   :  { %200 = vmatpush3.bf16.msra.mxu0 %v208_v2  ;;  %v115_v18 = vrot.slane %v111_v15, %v114_v16  ;;  %v159_v46 = vld [vmem:[%s292_s5] sm:$0x1]  ;;  %v152_v47 = vunpack.c.l.bf16 %v151_v44 }
   0x7   :  { %v160_v48 = vunpack.c.l.bf16 %v159_v46 }
   0x8   :  { %v31_v5 = vld [vmem:[#allocation2] sm:$0xff]  ;;  %v32_v8 = vld [vmem:[#allocation2 + $0x8] sm:$0xff]  ;;  %v156_v49 = vrot.slane %v152_v47, %v114_v16 }
   0x9   :  { %202 = vmatmul.mubr.msk.bf16.vlgmr.msra.gmra.mrb[0].mxu0 %vm28_vm0, %v209_v3  ;;  %v164_v51 = vrot.slane %v160_v48, %v114_v16 }
  0xdc   :  { %v94_v7 = vpop.f32.mrb[0].mxu0 }
  0xdd   :  { %v101_v10 = vadd.f32 %v94_v7, %v31_v5  ;;  %v203_v11 = vpop.f32.mrb[1].mxu0 }
  0xde   :  { %v97_v12 = vpop.f32.mrb[2].mxu0 }
  0xdf   :  { %103 = vst.msk [vmem:[#allocation2] sm:$0xff] %vm28_vm0, %v101_v10  ;;  %v102_v13 = vadd.f32 %v97_v12, %v32_v8  ;;  %v204_v14 = vpop.f32.mrb[3].mxu0 }
  0xe1   :  { %104 = vst.msk [vmem:[#allocation2 + $0x8] sm:$0xff] %vm28_vm0, %v102_v13 }
  0xe6   :  { %v108_v20 = vld [vmem:[#allocation2] sm:$0xff] }
  0xe7   :  { %v116_v21 = vadd.f32 %v115_v18, %v108_v20 }
  0xe8   :  { %v109_v23 = vld [vmem:[#allocation2 + $0x8] sm:$0xff] }
  0xe9   :  { %v122_v24 = vadd.f32 %v192_v19, %v116_v21  ;;  %v117_v25 = vadd.f32 %v115_v18, %v109_v23 }
  0xeb   :  { %v124_v26 = vsel %vm28_vm0, %v122_v24, 0.0  ;;  %v123_v27 = vadd.f32 %v193_v22, %v117_v25 }
  0xec   :  { %125 = vadd.xlane.f32.xlu0 %v124_v26 }
  0xed   :  { %v127_v28 = vsel %vm28_vm0, %v123_v27, 0.0 }
  0xf0   :  { %128 = vadd.xlane.f32.xlu0 %v127_v28 }
 0x179   :  { %v126_v29 = vpop.xlane.xlu0 %125 }
 0x17a   :  { %v131_v30 = vmul.f32 0.03125, %v126_v29 }
 0x17c   :  { %v133_v31 = vsub.f32 %v122_v24, %v131_v30 }
 0x17d   :  { %v129_v32 = vpop.xlane.xlu0 %128 }
 0x17e   :  { %v132_v33 = vmul.f32 0.03125, %v129_v32  ;;  %v135_v34 = vmul.f32 %v133_v31, %v133_v31 }
 0x180   :  { %v134_v35 = vsub.f32 %v123_v27, %v132_v33  ;;  %v137_v36 = vsel %vm28_vm0, %v135_v34, 0.0 }
 0x181   :  { %138 = vadd.xlane.f32.xlu1 %v137_v36 }
 0x182   :  { %v136_v37 = vmul.f32 %v134_v35, %v134_v35 }
 0x184   :  { %v140_v38 = vsel %vm28_vm0, %v136_v37, 0.0 }
 0x185   :  { %141 = vadd.xlane.f32.xlu1 %v140_v38 }
 0x20e   :  { %v139_v39 = vpop.xlane.xlu1 %138 }
 0x20f   :  { %v143_v40 = vmul.f32 0.03125, %v139_v39 }
 0x211   :  { %v145_v41 = vadd.f32 1e-05, %v143_v40 }
 0x212   :  { %v142_v42 = vpop.xlane.xlu1 %141 }
 0x213   :  { %210 = vrsqrt.f32 %v145_v41  ;;  %v144_v43 = vmul.f32 0.03125, %v142_v42 }
 0x215   :  { %v146_v45 = vadd.f32 1e-05, %v144_v43 }
 0x217   :  { %212 = vrsqrt.f32 %v146_v45 }
 0x21d   :  { %v211_v50 = vpop.eup %210 }
 0x21e   :  { %v149_v52 = vmul.f32 %v211_v50, %v133_v31 }
 0x220   :  { %v157_v53 = vmul.f32 %v156_v49, %v149_v52 }
 0x221   :  { %v213_v54 = vpop.eup %212 }
 0x222   :  { %v165_v55 = vadd.f32 %v164_v51, %v157_v53  ;;  %v150_v56 = vmul.f32 %v213_v54, %v134_v35 }
 0x224   :  { %v188_v57 = vpack.c.bf16 %v165_v55, %v165_v55  ;;  %v158_v58 = vmul.f32 %v156_v49, %v150_v56 }
 0x226   :  { %176 = vst.msk [vmem:[%s293_s6] sm:$0xf] %vm175_vm2, %v188_v57  ;;  %v166_v59 = vadd.f32 %v164_v51, %v158_v58 }
 0x228   :  { %v189_v60 = vpack.c.bf16 %v166_v59, %v166_v59 }
 0x22a   :  { %177 = vst.msk [vmem:[%s293_s6 + $0x4] sm:$0xf] %vm175_vm2, %v189_v60 }

// kernel: fwd.13
= control target key start
LH: loop header
LB: loop body
LE: loop exit
PB: predicated region body
PF: predicated region fallthrough
CT: control target
= control target key end

     0   :  { %vm19_vm0 = vcmask 523264   ;;  %v149_v0 = vmov 0.0   ;;  %vm150_vm1 = vmmov 0   ;;  %vm47_vm2 = vcmask 261120   ;;  %s193_s1 = inlined_call_operand.vmem [shape: bf16[32,64], index: 1, kind: input, shape index: {}]   ;;  %s194_s0 = inlined_call_operand.vmem [shape: bf16[16,32], index: 0, kind: input, shape index: {}]   ;;  %s195_s2 = inlined_call_operand.vmem [shape: bf16[1,64], index: 2, kind: input, shape index: {}]   ;;  %s196_s3 = inlined_call_operand.vmem [shape: bf16[16,64], index: 3, kind: output, shape index: {}]  }
   0x1   :  { %136 = vmatprep.subr.bf16.mxu0 %v149_v0  ;;  %v146_v1 = vld [vmem:[%s193_s1] sm:$0xff]   ;;  %140 = vmatprep.mubr.msk.bf16.mxu0 %vm150_vm1, %v149_v0  ;;  %20 = vst.msk [vmem:[#allocation2] sm:$0xff] %vm19_vm0, %v149_v0  ;;  %21 = vst.msk [vmem:[#allocation2 + $0x8] sm:$0xff] %vm19_vm0, %v149_v0  ;;  %v147_v2 = vld [vmem:[%s193_s1 + $0x8] sm:$0xff]   ;;  %v104_v4 = vlaneseq  ;;  %vm118_vm3 = vcmask 519168  }
   0x2   :  { %137 = vmatpush3.bf16.msra.mxu0 %v146_v1  ;;  %v148_v3 = vld [vmem:[%s194_s0] sm:$0xff]  }
   0x3   :  { %138 = vmatprep.subr.bf16.mxu0 %v149_v0  ;;  %v105_v6 = vshrl.u32 %v104_v4, 7  ;;  %v102_v8 = vld [vmem:[%s195_s2] sm:$0x1] }
   0x4   :  { %v103_v13 = vunpack.c.l.bf16 %v102_v8 }
   0x5   :  { %v106_v14 = vsub.s32 0, %v105_v6 }
   0x6   :  { %139 = vmatpush3.bf16.msra.mxu0 %v147_v2 }
   0x7   :  { %v107_v17 = vrot.slane %v103_v13, %v106_v14 }
   0x8   :  { %v22_v5 = vld [vmem:[#allocation2] sm:$0xff]  ;;  %v23_v9 = vld [vmem:[#allocation2 + $0x8] sm:$0xff] }
   0x9   :  { %141 = vmatmul.mubr.msk.bf16.vlgmr.msra.gmra.mrb[0].mxu0 %vm47_vm2, %v148_v3 }
  0xdc   :  { %v85_v7 = vpop.f32.mrb[0].mxu0 }
  0xdd   :  { %v92_v10 = vadd.f32 %v85_v7, %v22_v5  ;;  %v142_v11 = vpop.f32.mrb[1].mxu0 }
  0xde   :  { %v88_v12 = vpop.f32.mrb[2].mxu0 }
  0xdf   :  { %95 = vst.msk [vmem:[#allocation2] sm:$0xff] %vm19_vm0, %v92_v10  ;;  %v93_v15 = vadd.f32 %v88_v12, %v23_v9  ;;  %v143_v16 = vpop.f32.mrb[3].mxu0 }
  0xe1   :  { %96 = vst.msk [vmem:[#allocation2 + $0x8] sm:$0xff] %vm19_vm0, %v93_v15 }
  0xe6   :  { %v100_v18 = vld [vmem:[#allocation2] sm:$0xff] }
  0xe7   :  { %v108_v19 = vadd.f32 %v107_v17, %v100_v18 }
  0xe8   :  { %v101_v20 = vld [vmem:[#allocation2 + $0x8] sm:$0xff] }
  0xe9   :  { %v131_v21 = vpack.c.bf16 %v108_v19, %v108_v19  ;;  %v109_v22 = vadd.f32 %v107_v17, %v101_v20 }
  0xeb   :  { %119 = vst.msk [vmem:[%s196_s3] sm:$0xf] %vm118_vm3, %v131_v21  ;;  %v132_v23 = vpack.c.bf16 %v109_v22, %v109_v22 }
  0xed   :  { %120 = vst.msk [vmem:[%s196_s3 + $0x4] sm:$0xf] %vm118_vm3, %v132_v23 }

// kernel: fwd.14
= control target key start
LH: loop header
LB: loop body
LE: loop exit
PB: predicated region body
PF: predicated region fallthrough
CT: control target
= control target key end

     0   :  { %s809_s15 = smov 0   ;;  %s811_s16 = smov 0   ;;  %s883_s0 = inlined_call_operand.vmem [shape: bf16[2,4,8,8], index: 0, kind: input, shape index: {}]   ;;  %s884_s1 = inlined_call_operand.vmem [shape: bf16[2,4,8,8], index: 1, kind: input, shape index: {}]   ;;  %s885_s2 = inlined_call_operand.vmem [shape: bf16[2,4,8,8], index: 2, kind: input, shape index: {}]   ;;  %s886_s3 = inlined_call_operand.<no memory space> [shape: f32[1,1], index: 3, kind: input, shape index: {}]   ;;  %s887_s4 = inlined_call_operand.vmem [shape: bf16[2,4,8,8], index: 4, kind: output, shape index: {}]  }
   0x1   :  { %s813_s17 = smov 0   ;;  %s815_s18 = smov 0  }
   0x2   :  { %s817_s19 = smov 0  }
   0x3 LB: > { %s38_s3 = sadd.s32 1, %s770_s17  ;;  %s42_s20 = sadd.s32 1, %s774_s18  ;;  %s778_s19 = sphi %s817_s19, %s16_s19   ;;  %s774_s18 = sphi %s815_s18, %s891_s18   ;;  %s770_s17 = sphi %s813_s17, %s890_s17   ;;  %s766_s16 = sphi %s811_s16, %s889_s16   ;;  %s762_s15 = sphi %s809_s15, %s888_s15  }
   0x4   : > { %p40_p0 = scmp.ge.s32.totalorder %s38_s3, 4  ;;  %p659_p1 = scmp.ge.s32.totalorder %s778_s19, 1 }
   0x5   : > { %p244_p2 = scmp.lt.s32.totalorder %s778_s19, 9 }
   0x6   : > { %s893_s3 = smov (%p40_p0, %s38_s3), 0  ;;  %s895_s20 = smov (!%p40_p0, %s42_s20), %s774_s18 }
   0x7   : > { %p245_p3 = pnand %p659_p1, %p244_p2  ;;  %p44_p4 = scmp.ge.s32.totalorder %s895_s20, 2 }
   0x8   : > { %p304_p5 = scmp.lt.s32.totalorder (!%p245_p3), %s766_s16, 1  ;;  %p306_p6 = scmp.lt.s32.totalorder (!%p245_p3), %s762_s15, 3  ;;  %vm356_vm0 = vcmask (!%p245_p3), 64512   ;;  %v780_v0 = vmov (!%p245_p3), 0.0   ;;  %vm781_vm1 = vmmov (!%p245_p3), 0   ;;  %vm353_vm2 = vcmask (!%p245_p3), 7168  }
   0x9   : > { %s897_s20 = smov (%p44_p4, %s895_s20), 0  ;;  %248 = sbr.rel (%p245_p3) target bundleno = 827 (0x33b), region = 36 }
   0xa   : > { %676 = vmatprep.subr.bf16.mxu0 (!%p245_p3), %v780_v0  ;;  %357 = vst.msk [vmem:[#allocation4] sm:$0xff] (!%p245_p3), %vm356_vm0, %v780_v0  ;;  %678 = vmatprep.mubr.msk.bf16.mxu0 (!%p245_p3), %vm781_vm1, %v780_v0  ;;  %v782_v7 = vmov (!%p245_p3), -inf   ;;  %v783_v13 = vmov (!%p245_p3), 0   ;;  %vm446_vm3 = vcmask (!%p245_p3), 1043456   ;;  %vm506_vm4 = vcmask (!%p245_p3), 60416  }
   0xb   : > { %682 = vmatprep.subr.bf16.mxu1 (!%p245_p3), %v780_v0  ;;  %684 = vmatprep.mubr.msk.bf16.mxu1 (!%p245_p3), %vm781_vm1, %v780_v0  ;;  %354 = vst.msk [vmem:[#allocation2] sm:$0xff] (!%p245_p3), %vm353_vm2, %v782_v7  ;;  %355 = vst.msk [vmem:[#allocation3] sm:$0xff] (!%p245_p3), %vm353_vm2, %v780_v0 }
   0xc   : > { %732 = vset.pattern.permute.xlu0 (!%p245_p3), %v783_v13  ;;  %733 = vset.pattern.permute.xlu1 (!%p245_p3), %v783_v13 }
  0x10   : > { %s899_s16 = smov (!%p304_p5, %s766_s16), 1  ;;  %s901_s15 = smov (!%p306_p6, %s762_s15), 3 }
  0x11   : > { %s660_s21 = sshll.u32 %s899_s16, 2  ;;  %v435_v33 = vld [vmem:[#allocation4] sm:$0xff] }
  0x12   : > { %s312_s22 = sadd.s32 %s660_s21, %s901_s15  ;;  %v411_v14 = vld [vmem:[#allocation2] sm:$0xff]  ;;  %v427_v28 = vld [vmem:[#allocation3] sm:$0xff] }
  0x13   : > { %s840_s23 = sshll.u32 %s312_s22, 2 }
  0x14   : > { %s325_s26 = scalar_lea.vmem %s884_s1, %s840_s23  ;;  %s314_s29 = scalar_lea.vmem %s883_s0, %s840_s23 }
  0x15   : > { %v362_v1 = vld [vmem:[%s325_s26] sm:$0xf]  ;;  %s336_s6 = scalar_lea.vmem %s885_s2, %s840_s23  ;;  %s347_s9 = scalar_lea.vmem %s887_s4, %s840_s23 }
  0x16   : > { %v369_v2 = vsel %vm356_vm0, %v362_v1, 0  ;;  %v358_v3 = vld [vmem:[%s314_s29] sm:$0xf] }
  0x17   : > { %677 = vmatpush3.bf16.xpose.msra.mxu0 %v369_v2  ;;  %v359_v4 = vunpack.c.l.bf16 %v358_v3  ;;  %v363_v18 = vld [vmem:[%s336_s6] sm:$0xf] }
  0x18   : > { %v448_v19 = vsel %vm446_vm3, %v363_v18, 0 }
  0x19   : > { %v360_v5 = vmul.f32 0.35355338, %v359_v4  ;;  %683 = vmatpush3.bf16.msra.mxu1 %v448_v19 }
  0x1b   : > { %v361_v6 = vpack.c.bf16 %v360_v5, %v360_v5 }
  0x1e   : > { %679 = vmatmul.mubr.msk.bf16.vlgmr.msra.gmra.mrb[0].mxu0 %vm356_vm0, %v361_v6 }
  0xf1   : > { %v405_v8 = vpop.f32.mrb[0].mxu0 }
  0xf2   : > { %v680_v9 = vpop.f32.mrb[1].mxu0  ;;  %v412_v10 = vsel %vm356_vm0, %v405_v8, -inf }
  0xf3   : > { %413 = vmax.xlane.f32.xlu0 %v412_v10  ;;  %v408_v11 = vpop.f32.mrb[2].mxu0 }
  0xf4   : > { %v681_v12 = vpop.f32.mrb[3].mxu0 }
 0x180   : > { %v414_v15 = vpop.xlane.xlu0 %413 }
 0x181   : > { %v415_v16 = vmax.f32 %v411_v14, %v414_v15 }
 0x183   : > { %v416_v17 = vsub.f32 %v411_v14, %v415_v16  ;;  %492 = vst.msk [vmem:[#allocation2] sm:$0xff] %vm353_vm2, %v415_v16  ;;  %421 = vperm.xlu0 %732, %v415_v16  }
 0x185   : > { %v417_v26 = vmul.f32 1.442695, %v416_v17 }
 0x202   : > { %v422_v20 = vpop.permute.xlu0 %421 }
 0x203   : > { %v424_v21 = vsub.f32 %v405_v8, %v422_v20 }
 0x205   : > { %v425_v22 = vmul.f32 1.442695, %v424_v21 }
 0x207   : > { %734 = vpow2.f32 %v425_v22 }
 0x208   : > { %736 = vpow2.f32 %v417_v26 }
 0x211   : > { %v735_v23 = vpop.eup %734 }
 0x212   : > { %v429_v24 = vsel %vm356_vm0, %v735_v23, 0.0  ;;  %v442_v25 = vpack.c.bf16 %v735_v23, %v735_v23  ;;  %v737_v27 = vpop.eup %736 }
 0x213   : > { %430 = vadd.xlane.f32.xlu1 %v429_v24  ;;  %v428_v29 = vmul.f32 %v737_v27, %v427_v28 }
 0x214   : > { %685 = vmatmul.mubr.msk.bf16.vlgmr.msra.gmra.mrb[0].mxu1 %vm356_vm0, %v442_v25 }
 0x224   : > { %438 = vperm.xlu1 %733, %v737_v27  }
 0x2a0   : > { %v431_v30 = vpop.xlane.xlu1 %430 }
 0x2a1   : > { %v432_v31 = vadd.f32 %v431_v30, %v428_v29 }
 0x2a3   : > { %434 = vst.msk [vmem:[#allocation3] sm:$0xff] %vm353_vm2, %v432_v31 }
 0x2a4   : > { %v439_v34 = vpop.permute.xlu1 %438 }
 0x2a5   : > { %v441_v35 = vmul.f32 %v439_v34, %v435_v33 }
 0x2aa   : > { %v497_v32 = vld [vmem:[#allocation3] sm:$0xff] }
 0x2ab   : > { %500 = vperm.xlu1 %733, %v497_v32  }
 0x2e7   : > { %v484_v36 = vpop.f32.mrb[0].mxu1 }
 0x2e8   : > { %v490_v37 = vadd.f32 %v484_v36, %v441_v35  ;;  %v686_v38 = vpop.f32.mrb[1].mxu1 }
 0x2e9   : > { %v487_v39 = vpop.f32.mrb[2].mxu1 }
 0x2ea   : > { %491 = vst.msk [vmem:[#allocation4] sm:$0xff] %vm356_vm0, %v490_v37  ;;  %v687_v40 = vpop.f32.mrb[3].mxu1 }
 0x2f1   : > { %v496_v43 = vld [vmem:[#allocation4] sm:$0xff] }
 0x32a   : > { %v501_v41 = vpop.permute.xlu1 %500 }
 0x32b   : > { %738 = vrcp.f32 %v501_v41 }
 0x335   : > { %v739_v42 = vpop.eup %738 }
 0x336   : > { %v504_v44 = vmul.f32 %v739_v42, %v496_v43 }
 0x338   : > { %v505_v45 = vpack.c.bf16 %v504_v44, %v504_v44 }
 0x33a   : > { %507 = vst.msk [vmem:[%s347_s9] sm:$0xf] %vm506_vm4, %v505_v45 }
 0x33b PF: > { %s16_s19 = sadd.s32 1, %s778_s19   ;;  %s888_s15 = smov %s770_s17 }
 0x33c   : > { %p13_p7 = scmp.ge.s32.totalorder %s16_s19, 10   ;;  %s889_s16 = smov %s774_s18 }
 0x33d   : > { %s890_s17 = smov %s893_s3  ;;  %s891_s18 = smov %s897_s20 }
 0x33e   :  { %15 = sbr.rel (!%p13_p7) target bundleno = 3 (0x3), region = 80 }

// kernel: fwd.16
= control target key start
LH: loop header
LB: loop body
LE: loop exit
PB: predicated region body
PF: predicated region fallthrough
CT: control target
= control target key end

     0   :  { %vm19_vm0 = vcmask 523264   ;;  %v171_v0 = vmov 0.0   ;;  %vm172_vm1 = vmmov 0   ;;  %vm47_vm2 = vcmask 261120   ;;  %s215_s1 = inlined_call_operand.vmem [shape: bf16[32,64], index: 1, kind: input, shape index: {}]   ;;  %s216_s0 = inlined_call_operand.vmem [shape: bf16[16,32], index: 0, kind: input, shape index: {}]   ;;  %s217_s2 = inlined_call_operand.vmem [shape: bf16[1,64], index: 2, kind: input, shape index: {}]   ;;  %s218_s3 = inlined_call_operand.vmem [shape: bf16[16,64], index: 3, kind: output, shape index: {}]  }
   0x1   :  { %154 = vmatprep.subr.bf16.mxu0 %v171_v0  ;;  %v164_v1 = vld [vmem:[%s215_s1] sm:$0xff]   ;;  %158 = vmatprep.mubr.msk.bf16.mxu0 %vm172_vm1, %v171_v0  ;;  %20 = vst.msk [vmem:[#allocation2] sm:$0xff] %vm19_vm0, %v171_v0  ;;  %21 = vst.msk [vmem:[#allocation2 + $0x8] sm:$0xff] %vm19_vm0, %v171_v0  ;;  %v165_v2 = vld [vmem:[%s215_s1 + $0x8] sm:$0xff]   ;;  %v104_v4 = vlaneseq  ;;  %vm136_vm3 = vcmask 519168  }
   0x2   :  { %155 = vmatpush3.bf16.msra.mxu0 %v164_v1  ;;  %v166_v3 = vld [vmem:[%s216_s0] sm:$0xff]  }
   0x3   :  { %156 = vmatprep.subr.bf16.mxu0 %v171_v0  ;;  %v105_v6 = vshrl.u32 %v104_v4, 7  ;;  %v102_v8 = vld [vmem:[%s217_s2] sm:$0x1] }
   0x4   :  { %v103_v13 = vunpack.c.l.bf16 %v102_v8 }
   0x5   :  { %v106_v14 = vsub.s32 0, %v105_v6 }
   0x6   :  { %157 = vmatpush3.bf16.msra.mxu0 %v165_v2 }
   0x7   :  { %v107_v17 = vrot.slane %v103_v13, %v106_v14 }
   0x8   :  { %v22_v5 = vld [vmem:[#allocation2] sm:$0xff]  ;;  %v23_v9 = vld [vmem:[#allocation2 + $0x8] sm:$0xff] }
   0x9   :  { %159 = vmatmul.mubr.msk.bf16.vlgmr.msra.gmra.mrb[0].mxu0 %vm47_vm2, %v166_v3 }
  0xdc   :  { %v85_v7 = vpop.f32.mrb[0].mxu0 }
  0xdd   :  { %v92_v10 = vadd.f32 %v85_v7, %v22_v5  ;;  %v160_v11 = vpop.f32.mrb[1].mxu0 }
  0xde   :  { %v88_v12 = vpop.f32.mrb[2].mxu0 }
  0xdf   :  { %95 = vst.msk [vmem:[#allocation2] sm:$0xff] %vm19_vm0, %v92_v10  ;;  %v93_v15 = vadd.f32 %v88_v12, %v23_v9  ;;  %v161_v16 = vpop.f32.mrb[3].mxu0 }
  0xe1   :  { %96 = vst.msk [vmem:[#allocation2 + $0x8] sm:$0xff] %vm19_vm0, %v93_v15 }
  0xe6   :  { %v100_v18 = vld [vmem:[#allocation2] sm:$0xff] }
  0xe7   :  { %v108_v19 = vadd.f32 %v107_v17, %v100_v18 }
  0xe8   :  { %v101_v20 = vld [vmem:[#allocation2 + $0x8] sm:$0xff] }
  0xe9   :  { %v112_v21 = vmul.f32 0.044715, %v108_v19  ;;  %v109_v22 = vadd.f32 %v107_v17, %v101_v20  ;;  %v110_v33 = vmul.f32 0.5, %v108_v19 }
  0xeb   :  { %v114_v23 = vmul.f32 %v112_v21, %v108_v19  ;;  %v113_v24 = vmul.f32 0.044715, %v109_v22  ;;  %v111_v37 = vmul.f32 0.5, %v109_v22 }
  0xed   :  { %v116_v25 = vmul.f32 %v114_v23, %v108_v19  ;;  %v115_v26 = vmul.f32 %v113_v24, %v109_v22 }
  0xef   :  { %v118_v27 = vadd.f32 %v116_v25, %v108_v19  ;;  %v117_v28 = vmul.f32 %v115_v26, %v109_v22 }
  0xf1   :  { %v120_v29 = vmul.f32 0.7978846, %v118_v27  ;;  %v119_v30 = vadd.f32 %v117_v28, %v109_v22 }
  0xf3   :  { %167 = vtanh.f32 %v120_v29  ;;  %v121_v31 = vmul.f32 0.7978846, %v119_v30 }
  0xf5   :  { %169 = vtanh.f32 %v121_v31 }
  0xfd   :  { %v168_v32 = vpop.eup %167 }
  0xfe   :  { %v124_v34 = vadd.f32 1.0, %v168_v32 }
  0xff   :  { %v170_v35 = vpop.eup %169 }
 0x100   :  { %v126_v36 = vmul.f32 %v124_v34, %v110_v33  ;;  %v125_v38 = vadd.f32 1.0, %v170_v35 }
 0x102   :  { %v149_v39 = vpack.c.bf16 %v126_v36, %v126_v36  ;;  %v127_v40 = vmul.f32 %v125_v38, %v111_v37 }
 0x104   :  { %137 = vst.msk [vmem:[%s218_s3] sm:$0xf] %vm136_vm3, %v149_v39  ;;  %v150_v41 = vpack.c.bf16 %v127_v40, %v127_v40 }
 0x106   :  { %138 = vst.msk [vmem:[%s218_s3 + $0x4] sm:$0xf] %vm136_vm3, %v150_v41 }

// kernel: fwd.17
= control target key start
LH: loop header
LB: loop body
LE: loop exit
PB: predicated region body
PF: predicated region fallthrough
CT: control target
= control target key end

     0   :  { %vm28_vm0 = vcmask 261120   ;;  %v241_v0 = vmov 0.0   ;;  %vm242_vm1 = vmmov 0   ;;  %vm72_vm2 = vcmask 523264   ;;  %s319_s1 = inlined_call_operand.vmem [shape: bf16[64,32], index: 1, kind: input, shape index: {}]   ;;  %s320_s0 = inlined_call_operand.vmem [shape: bf16[16,64], index: 0, kind: input, shape index: {}]   ;;  %s321_s2 = inlined_call_operand.vmem [shape: bf16[1,32], index: 2, kind: input, shape index: {}]   ;;  %s322_s3 = inlined_call_operand.vmem [shape: bf16[16,32], index: 3, kind: input, shape index: {}]   ;;  %s323_s4 = inlined_call_operand.vmem [shape: bf16[1,32], index: 4, kind: input, shape index: {}]   ;;  %s324_s5 = inlined_call_operand.vmem [shape: bf16[1,32], index: 5, kind: input, shape index: {}]   ;;  %s325_s6 = inlined_call_operand.vmem [shape: bf16[16,32], index: 6, kind: output, shape index: {}]  }
   0x1   :  { %218 = vmatprep.subr.bf16.mxu0 %v241_v0  ;;  %v232_v1 = vld [vmem:[%s319_s1] sm:$0xff]   ;;  %226 = vmatprep.mubr.msk.bf16.mxu0 %vm242_vm1, %v241_v0  ;;  %29 = vst.msk [vmem:[#allocation2] sm:$0xff] %vm28_vm0, %v241_v0  ;;  %30 = vst.msk [vmem:[#allocation2 + $0x8] sm:$0xff] %vm28_vm0, %v241_v0  ;;  %v233_v2 = vld [vmem:[%s319_s1 + $0x8] sm:$0xff]   ;;  %v129_v6 = vlaneseq  ;;  %vm192_vm3 = vcmask 257024  }
   0x2   :  { %219 = vmatpush3.bf16.msra.mxu0 %v232_v1  ;;  %v234_v3 = vld [vmem:[%s319_s1 + $0x10] sm:$0xff]   ;;  %v235_v4 = vld [vmem:[%s319_s1 + $0x18] sm:$0xff]   ;;  %v236_v5 = vld [vmem:[%s320_s0] sm:$0xff]  }
   0x3   :  { %220 = vmatprep.subr.bf16.mxu0 %v241_v0  ;;  %v130_v8 = vshrl.u32 %v129_v6, 7  ;;  %v127_v11 = vld [vmem:[%s321_s2] sm:$0x1] }
   0x4   :  { %v128_v17 = vunpack.c.l.bf16 %v127_v11  ;;  %v210_v19 = vld [vmem:[%s322_s3] sm:$0xff]  }
   0x5   :  { %v131_v18 = vsub.s32 0, %v130_v8  ;;  %v211_v21 = vunpack.c.l.bf16 %v210_v19  ;;  %v212_v24 = vunpack.c.h.bf16 %v210_v19  ;;  %v168_v46 = vld [vmem:[%s323_s4] sm:$0x1] }
   0x6   :  { %221 = vmatpush3.bf16.msra.mxu0 %v233_v2  ;;  %v176_v48 = vld [vmem:[%s324_s5] sm:$0x1]  ;;  %v169_v49 = vunpack.c.l.bf16 %v168_v46 }
   0x7   :  { %222 = vmatprep.subr.bf16.mxu0 %v241_v0  ;;  %v132_v20 = vrot.slane %v128_v17, %v131_v18  ;;  %v177_v50 = vunpack.c.l.bf16 %v176_v48 }
   0x8   :  { %v31_v7 = vld [vmem:[#allocation2] sm:$0xff]  ;;  %v32_v10 = vld [vmem:[#allocation2 + $0x8] sm:$0xff]  ;;  %v173_v51 = vrot.slane %v169_v49, %v131_v18 }
   0x9   :  { %v181_v53 = vrot.slane %v177_v50, %v131_v18 }
   0xa   :  { %223 = vmatpush3.bf16.msra.mxu0 %v234_v3 }
   0xb   :  { %224 = vmatprep.subr.bf16.mxu0 %v241_v0 }
   0xe   :  { %225 = vmatpush3.bf16.msra.mxu0 %v235_v4 }
  0x11   :  { %227 = vmatmul.mubr.msk.bf16.vlgmr.msra.gmra.mrb[0].mxu0 %vm72_vm2, %v236_v5 }
  0xe4   :  { %v110_v9 = vpop.f32.mrb[0].mxu0 }
  0xe5   :  { %v117_v12 = vadd.f32 %v110_v9, %v31_v7  ;;  %v228_v13 = vpop.f32.mrb[1].mxu0 }
  0xe6   :  { %v113_v14 = vpop.f32.mrb[2].mxu0 }
  0xe7   :  { %120 = vst.msk [vmem:[#allocation2] sm:$0xff] %vm28_vm0, %v117_v12  ;;  %v118_v15 = vadd.f32 %v113_v14, %v32_v10  ;;  %v229_v16 = vpop.f32.mrb[3].mxu0 }
  0xe9   :  { %121 = vst.msk [vmem:[#allocation2 + $0x8] sm:$0xff] %vm28_vm0, %v118_v15 }
  0xee   :  { %v125_v22 = vld [vmem:[#allocation2] sm:$0xff] }
  0xef   :  { %v133_v23 = vadd.f32 %v132_v20, %v125_v22 }
  0xf0   :  { %v126_v25 = vld [vmem:[#allocation2 + $0x8] sm:$0xff] }
  0xf1   :  { %v139_v26 = vadd.f32 %v211_v21, %v133_v23  ;;  %v134_v27 = vadd.f32 %v132_v20, %v126_v25 }
  0xf3   :  { %v141_v28 = vsel %vm28_vm0, %v139_v26, 0.0  ;;  %v140_v29 = vadd.f32 %v212_v24, %v134_v27 }
  0xf4   :  { %142 = vadd.xlane.f32.xlu0 %v141_v28 }
  0xf5   :  { %v144_v30 = vsel %vm28_vm0, %v140_v29, 0.0 }
  0xf8   :  { %145 = vadd.xlane.f32.xlu0 %v144_v30 }
 0x181   :  { %v143_v31 = vpop.xlane.xlu0 %142 }
 0x182   :  { %v148_v32 = vmul.f32 0.03125, %v143_v31 }
 0x184   :  { %v150_v33 = vsub.f32 %v139_v26, %v148_v32 }
 0x185   :  { %v146_v34 = vpop.xlane.xlu0 %145 }
 0x186   :  { %v149_v35 = vmul.f32 0.03125, %v146_v34  ;;  %v152_v36 = vmul.f32 %v150_v33, %v150_v33 }
 0x188   :  { %v151_v37 = vsub.f32 %v140_v29, %v149_v35  ;;  %v154_v38 = vsel %vm28_vm0, %v152_v36, 0.0 }
 0x189   :  { %155 = vadd.xlane.f32.xlu1 %v154_v38 }
 0x18a   :  { %v153_v39 = vmul.f32 %v151_v37, %v151_v37 }
 0x18c   :  { %v157_v40 = vsel %vm28_vm0, %v153_v39, 0.0 }
 0x18d   :  { %158 = vadd.xlane.f32.xlu1 %v157_v40 }
 0x216   :  { %v156_v41 = vpop.xlane.xlu1 %155 }
 0x217   :  { %v160_v42 = vmul.f32 0.03125, %v156_v41 }
 0x219   :  { %v162_v43 = vadd.f32 1e-05, %v160_v42 }
 0x21a   :  { %v159_v44 = vpop.xlane.xlu1 %158 }
 0x21b   :  { %237 = vrsqrt.f32 %v162_v43  ;;  %v161_v45 = vmul.f32 0.03125, %v159_v44 }
 0x21d   :  { %v163_v47 = vadd.f32 1e-05, %v161_v45 }
 0x21f   :  { %239 = vrsqrt.f32 %v163_v47 }
 0x225   :  { %v238_v52 = vpop.eup %237 }
 0x226   :  { %v166_v54 = vmul.f32 %v238_v52, %v150_v33 }
 0x228   :  { %v174_v55 = vmul.f32 %v173_v51, %v166_v54 }
 0x229   :  { %v240_v56 = vpop.eup %239 }
 0x22a   :  { %v182_v57 = vadd.f32 %v181_v53, %v174_v55  ;;  %v167_v58 = vmul.f32 %v240_v56, %v151_v37 }
 0x22c   :  { %v207_v59 = vpack.c.bf16 %v182_v57, %v182_v57  ;;  %v175_v60 = vmul.f32 %v173_v51, %v167_v58 }
 0x22e   :  { %193 = vst.msk [vmem:[%s325_s6] sm:$0xf] %vm192_vm3, %v207_v59  ;;  %v183_v61 = vadd.f32 %v181_v53, %v175_v60 }
 0x230   :  { %v208_v62 = vpack.c.bf16 %v183_v61, %v183_v61 }
 0x232   :  { %194 = vst.msk [vmem:[%s325_s6 + $0x4] sm:$0xf] %vm192_vm3, %v208_v62 }

</bundles_post_ra>
